<compile_context>
chip_gen: v7x
topology: tpu7x:2x2x1
jax: 0.10.0
libtpu: 0.0.40
codegen_flags: <defaults>
</compile_context>

<pallas_src>
import jax
import jax.numpy as jnp
from jax.experimental import pallas as pl
from jax.experimental.pallas import tpu as pltpu


def _round_up(x, m):
    return (x + m - 1) // m * m


def _cdiv(a, b):
    return (a + b - 1) // b


# -----------------------------------------------------------------------------
# Kernels
# -----------------------------------------------------------------------------
def _pe_kernel_split(t_ref, de_ref, do_ref, o_ref):
    """Half-width cos/sin, lane interleave before the store.

    t_ref:  (tile_n, 1)       f32 timesteps
    de_ref: (1, tile_d // 2)  f32 denom at even output columns
    do_ref: (1, tile_d // 2)  f32 denom at odd output columns
    o_ref:  (tile_n, tile_d)  f32 output tile
    """
    t = t_ref[...]
    c = jnp.cos(t * de_ref[...])          # (tile_n, tile_d//2) -> even columns
    s = jnp.sin(t * do_ref[...])          # (tile_n, tile_d//2) -> odd columns
    tn, th = c.shape
    # Interleave along lanes: out[:, 2j] = c[:, j], out[:, 2j+1] = s[:, j].
    o_ref[...] = jnp.stack([c, s], axis=-1).reshape(tn, 2 * th)


def _pe_kernel_masked(t_ref, denom_ref, mask_ref, o_ref):
    """Fallback: full-width cos and sin + select (previous, known-good kernel)."""
    emb = t_ref[...] * denom_ref[...]
    o_ref[...] = jnp.where(mask_ref[...] != 0.0, jnp.cos(emb), jnp.sin(emb))


# -----------------------------------------------------------------------------
# pallas_call builders
# -----------------------------------------------------------------------------
_COMPILER_PARAMS = pltpu.CompilerParams(
    dimension_semantics=("parallel", "parallel"),
    vmem_limit_bytes=48 * 1024 * 1024,
)


def _pe_call_split(time_f, denom_even, denom_odd, tile_n, tile_d):
    n_p = time_f.shape[0]
    dim_p = 2 * denom_even.shape[1]
    th = tile_d // 2
    grid = (n_p // tile_n, dim_p // tile_d)
    cost = pl.CostEstimate(
        flops=2 * n_p * dim_p,
        transcendentals=n_p * dim_p,
        bytes_accessed=4 * (n_p * dim_p + n_p + dim_p),
    )
    return pl.pallas_call(
        _pe_kernel_split,
        out_shape=jax.ShapeDtypeStruct((n_p, dim_p), jnp.float32),
        grid_spec=pltpu.PrefetchScalarGridSpec(
            num_scalar_prefetch=0,
            grid=grid,
            in_specs=[
                pl.BlockSpec((tile_n, 1), lambda i, j: (i, 0)),
                pl.BlockSpec((1, th), lambda i, j: (0, j)),
                pl.BlockSpec((1, th), lambda i, j: (0, j)),
            ],
            out_specs=pl.BlockSpec((tile_n, tile_d), lambda i, j: (i, j)),
        ),
        compiler_params=_COMPILER_PARAMS,
        cost_estimate=cost,
    )(time_f, denom_even, denom_odd)


def _pe_call_masked(time_f, denom, even_mask, tile_n, tile_d):
    n_p = time_f.shape[0]
    dim_p = denom.shape[1]
    grid = (n_p // tile_n, dim_p // tile_d)
    cost = pl.CostEstimate(
        flops=2 * n_p * dim_p,
        transcendentals=2 * n_p * dim_p,
        bytes_accessed=4 * (n_p * dim_p + n_p + 2 * dim_p),
    )
    return pl.pallas_call(
        _pe_kernel_masked,
        out_shape=jax.ShapeDtypeStruct((n_p, dim_p), jnp.float32),
        grid_spec=pltpu.PrefetchScalarGridSpec(
            num_scalar_prefetch=0,
            grid=grid,
            in_specs=[
                pl.BlockSpec((tile_n, 1), lambda i, j: (i, 0)),
                pl.BlockSpec((1, tile_d), lambda i, j: (0, j)),
                pl.BlockSpec((1, tile_d), lambda i, j: (0, j)),
            ],
            out_specs=pl.BlockSpec((tile_n, tile_d), lambda i, j: (i, j)),
        ),
        compiler_params=_COMPILER_PARAMS,
        cost_estimate=cost,
    )(time_f, denom, even_mask)


# -----------------------------------------------------------------------------
# One-time capability probe for the in-kernel lane interleave.
# -----------------------------------------------------------------------------
_SPLIT_SUPPORTED = None


def _split_interleave_supported():
    global _SPLIT_SUPPORTED
    if _SPLIT_SUPPORTED is None:
        try:
            ok = True
            t = jnp.zeros((8, 1), jnp.float32)
            for half in (64, 128):
                ones = jnp.ones((1, half), jnp.float32)
                out = jax.block_until_ready(
                    _pe_call_split(t, ones, ones, 8, 2 * half))
                # time == 0 -> exactly cos(0)=1 on even lanes, sin(0)=0 on odd.
                expect = jnp.tile(jnp.asarray([1.0, 0.0], jnp.float32), half)
                ok = ok and bool(jnp.allclose(out, expect[None, :], atol=1e-6))
            _SPLIT_SUPPORTED = ok
        except Exception:   # interleave does not lower on this backend/version
            _SPLIT_SUPPORTED = False
    return _SPLIT_SUPPORTED


# -----------------------------------------------------------------------------
# Public wrapper
# -----------------------------------------------------------------------------
def positional_encoding(time, dim, *, tile_n=1024, tile_d=1024):
    """Pallas equivalent of PositionalEncoding(dim).forward(time) -> (N, dim) f32."""
    time_f = jnp.asarray(time).astype(jnp.float32).reshape(-1, 1)   # (N, 1)
    n = time_f.shape[0]

    # ---- column (dim) tiling: tile_d always divides dim_p; with more than one
    # d-tile, tile_d is a multiple of 256 so the even/odd halves stay
    # 128-lane aligned.  Every store is a full-vreg, unmasked store.
    dim_p = _round_up(max(dim, 1), 128)
    if dim_p <= tile_d:
        tile_d = dim_p                                   # single d-tile
    else:
        dim_p = _round_up(dim, 256)
        cap = max(1, tile_d // 256)
        for u in range(cap, 0, -1):
            if (dim_p // 256) % u == 0:
                tile_d = 256 * u
                break

    # ---- row (time) tiling: near-equal multiple-of-8 blocks that exactly tile
    # the padded row count (only a handful of extra rows in total).
    n8 = _round_up(max(n, 1), 8)
    tile_n = max(8, min(_round_up(tile_n, 8), n8))
    n_blocks = _cdiv(n8, tile_n)
    tile_n = _round_up(_cdiv(n8, n_blocks), 8)
    n_p = tile_n * n_blocks

    # ---- v7x megacore: guarantee >= 2 steps along at least one parallel axis.
    if n_p // tile_n == 1 and dim_p // tile_d == 1:
        if n_p >= 16:
            tile_n = _round_up(_cdiv(n_p, 2), 8)
            n_p = 2 * tile_n
        elif dim_p % 512 == 0:
            tile_d = dim_p // 2

    if n_p != n:
        time_f = jnp.pad(time_f, ((0, n_p - n), (0, 0)))

    # denom[j] = 10000 ** (2*j / dim); padded columns clamped to a finite value
    # (they are sliced off below).
    col = jnp.arange(dim_p, dtype=jnp.float32)
    col_c = jnp.minimum(col, jnp.float32(max(dim - 1, 0)))
    denom = jnp.float32(10000.0) ** (2.0 * col_c / jnp.float32(dim))

    out = None
    if _split_interleave_supported():
        try:
            denom_even = denom[0::2].reshape(1, dim_p // 2)
            denom_odd = denom[1::2].reshape(1, dim_p // 2)
            out = _pe_call_split(time_f, denom_even, denom_odd, tile_n, tile_d)
        except Exception:
            out = None
    if out is None:
        even_mask = ((jnp.arange(dim_p) % 2) == 0).astype(jnp.float32)
        out = _pe_call_masked(time_f, denom.reshape(1, dim_p),
                              even_mask.reshape(1, dim_p), tile_n, tile_d)

    if n_p != n or dim_p != dim:
        out = out[:n, :dim]        # skipped entirely when there is no padding
    return out


if __name__ == "__main__":
    key = jax.random.PRNGKey(0)
    N, DIM = 8, 32
    # Timesteps: small integer-valued times (like diffusion step indices).
    time = jax.random.randint(key, (N,), minval=0, maxval=100, dtype=jnp.int32)

    out = positional_encoding(time, DIM)
    out = jax.block_until_ready(out)

    # Plain-JAX reference with the PyTorch semantics.
    t = time.astype(jnp.float32)[:, None]
    d = (jnp.float32(10000.0)
         ** (2.0 * jnp.arange(DIM, dtype=jnp.float32) / jnp.float32(DIM)))[None, :]
    emb = t * d
    cols = jnp.arange(DIM)
    ref = jnp.where((cols % 2) == 0, jnp.cos(emb), jnp.sin(emb))

    assert out.shape == (N, DIM) and out.dtype == jnp.float32
    assert jnp.allclose(out, ref, atol=1e-5, rtol=1e-5), float(
        jnp.max(jnp.abs(out - ref)))

    print("KERNEL_OK")
</pallas_src>

<mosaic_0001>
module attributes {stable_mosaic.version = 11 : i64} {
  func.func @_pe_kernel_split(%arg0: i32, %arg1: i32, %arg2: memref<8x1xf32, #tpu.memory_space<vmem>>, %arg3: memref<1x64xf32, #tpu.memory_space<vmem>>, %arg4: memref<1x64xf32, #tpu.memory_space<vmem>>, %arg5: memref<8x128xf32, #tpu.memory_space<vmem>>) attributes {dimension_semantics = [#tpu.dimension_semantics<parallel>, #tpu.dimension_semantics<parallel>], iteration_bounds = array<i64: 1, 1>, scalar_prefetch = 0 : i64, scratch_operands = 0 : i64, tpu.core_type = #tpu.core_type<tc>, window_params = [{transform_indices = @transform_0, window_bounds = array<i64: 8, 1>}, {transform_indices = @transform_1, window_bounds = array<i64: 1, 64>}, {transform_indices = @transform_2, window_bounds = array<i64: 1, 64>}, {transform_indices = @transform_3, window_bounds = array<i64: 8, 128>}]} {
    %c0 = arith.constant 0 : index
    %c0_0 = arith.constant 0 : index
    %0 = vector.load %arg2[%c0, %c0_0] : memref<8x1xf32, #tpu.memory_space<vmem>>, vector<8x1xf32>
    %c0_1 = arith.constant 0 : index
    %c0_2 = arith.constant 0 : index
    %1 = vector.load %arg3[%c0_1, %c0_2] : memref<1x64xf32, #tpu.memory_space<vmem>>, vector<1x64xf32>
    %2 = vector.broadcast %0 : vector<8x1xf32> to vector<8x64xf32>
    %3 = vector.broadcast %1 : vector<1x64xf32> to vector<8x64xf32>
    %4 = arith.mulf %2, %3 : vector<8x64xf32>
    %5 = math.cos %4 : vector<8x64xf32>
    %c0_3 = arith.constant 0 : index
    %c0_4 = arith.constant 0 : index
    %6 = vector.load %arg4[%c0_3, %c0_4] : memref<1x64xf32, #tpu.memory_space<vmem>>, vector<1x64xf32>
    %7 = vector.broadcast %0 : vector<8x1xf32> to vector<8x64xf32>
    %8 = vector.broadcast %6 : vector<1x64xf32> to vector<8x64xf32>
    %9 = arith.mulf %7, %8 : vector<8x64xf32>
    %10 = math.sin %9 : vector<8x64xf32>
    %11 = vector.shape_cast %5 : vector<8x64xf32> to vector<8x64x1xf32>
    %12 = vector.shape_cast %10 : vector<8x64xf32> to vector<8x64x1xf32>
    %13 = tpu.concatenate %11, %12 in 2 : vector<8x64x1xf32>, vector<8x64x1xf32> -> vector<8x64x2xf32>
    %14 = vector.shape_cast %13 : vector<8x64x2xf32> to vector<8x128xf32>
    %c0_5 = arith.constant 0 : index
    %c0_6 = arith.constant 0 : index
    %15 = vector.load %arg5[%c0_5, %c0_6] : memref<8x128xf32, #tpu.memory_space<vmem>>, vector<8x128xf32>
    tpu.vector_store %arg5[%c0_5, %c0_6], %14 {strides = array<i32>} : memref<8x128xf32, #tpu.memory_space<vmem>>, vector<8x128xf32>,
    return
  }
  func.func @transform_0(%arg0: i32, %arg1: i32) -> (i32, i32) {
    %c0_i32 = arith.constant 0 : i32
    %c0_i32_0 = arith.constant 0 : i32
    return %arg0, %c0_i32 : i32, i32
  }
  func.func @transform_1(%arg0: i32, %arg1: i32) -> (i32, i32) {
    %c0_i32 = arith.constant 0 : i32
    %c0_i32_0 = arith.constant 0 : i32
    return %c0_i32, %arg1 : i32, i32
  }
  func.func @transform_2(%arg0: i32, %arg1: i32) -> (i32, i32) {
    %c0_i32 = arith.constant 0 : i32
    %c0_i32_0 = arith.constant 0 : i32
    return %c0_i32, %arg1 : i32, i32
  }
  func.func @transform_3(%arg0: i32, %arg1: i32) -> (i32, i32) {
    %c0_i32 = arith.constant 0 : i32
    return %arg0, %arg1 : i32, i32
  }
}

module attributes {stable_mosaic.version = 11 : i64} {
  func.func @_pe_kernel_masked(%arg0: i32, %arg1: i32, %arg2: memref<8x1xf32, #tpu.memory_space<vmem>>, %arg3: memref<1x128xf32, #tpu.memory_space<vmem>>, %arg4: memref<1x128xf32, #tpu.memory_space<vmem>>, %arg5: memref<8x128xf32, #tpu.memory_space<vmem>>) attributes {dimension_semantics = [#tpu.dimension_semantics<parallel>, #tpu.dimension_semantics<parallel>], iteration_bounds = array<i64: 1, 1>, scalar_prefetch = 0 : i64, scratch_operands = 0 : i64, tpu.core_type = #tpu.core_type<tc>, window_params = [{transform_indices = @transform_0, window_bounds = array<i64: 8, 1>}, {transform_indices = @transform_1, window_bounds = array<i64: 1, 128>}, {transform_indices = @transform_2, window_bounds = array<i64: 1, 128>}, {transform_indices = @transform_3, window_bounds = array<i64: 8, 128>}]} {
    %c0 = arith.constant 0 : index
    %c0_0 = arith.constant 0 : index
    %0 = vector.load %arg2[%c0, %c0_0] : memref<8x1xf32, #tpu.memory_space<vmem>>, vector<8x1xf32>
    %c0_1 = arith.constant 0 : index
    %c0_2 = arith.constant 0 : index
    %1 = vector.load %arg3[%c0_1, %c0_2] : memref<1x128xf32, #tpu.memory_space<vmem>>, vector<1x128xf32>
    %2 = vector.broadcast %0 : vector<8x1xf32> to vector<8x128xf32>
    %3 = vector.broadcast %1 : vector<1x128xf32> to vector<8x128xf32>
    %4 = arith.mulf %2, %3 : vector<8x128xf32>
    %c0_3 = arith.constant 0 : index
    %c0_4 = arith.constant 0 : index
    %5 = vector.load %arg4[%c0_3, %c0_4] : memref<1x128xf32, #tpu.memory_space<vmem>>, vector<1x128xf32>
    %cst = arith.constant 0.000000e+00 : f32
    %6 = vector.broadcast %cst : f32 to vector<1x128xf32>
    %7 = arith.cmpf one, %5, %6 : vector<1x128xf32>
    %8 = math.cos %4 : vector<8x128xf32>
    %9 = math.sin %4 : vector<8x128xf32>
    %10 = vector.shape_cast %7 : vector<1x128xi1> to vector<1x128xi1>
    %11 = vector.broadcast %10 : vector<1x128xi1> to vector<8x128xi1>
    %12 = arith.select %11, %8, %9 : vector<8x128xi1>, vector<8x128xf32>
    %c0_5 = arith.constant 0 : index
    %c0_6 = arith.constant 0 : index
    %13 = vector.load %arg5[%c0_5, %c0_6] : memref<8x128xf32, #tpu.memory_space<vmem>>, vector<8x128xf32>
    tpu.vector_store %arg5[%c0_5, %c0_6], %12 {strides = array<i32>} : memref<8x128xf32, #tpu.memory_space<vmem>>, vector<8x128xf32>,
    return
  }
  func.func @transform_0(%arg0: i32, %arg1: i32) -> (i32, i32) {
    %c0_i32 = arith.constant 0 : i32
    %c0_i32_0 = arith.constant 0 : i32
    return %arg0, %c0_i32 : i32, i32
  }
  func.func @transform_1(%arg0: i32, %arg1: i32) -> (i32, i32) {
    %c0_i32 = arith.constant 0 : i32
    %c0_i32_0 = arith.constant 0 : i32
    return %c0_i32, %arg1 : i32, i32
  }
  func.func @transform_2(%arg0: i32, %arg1: i32) -> (i32, i32) {
    %c0_i32 = arith.constant 0 : i32
    %c0_i32_0 = arith.constant 0 : i32
    return %c0_i32, %arg1 : i32, i32
  }
  func.func @transform_3(%arg0: i32, %arg1: i32) -> (i32, i32) {
    %c0_i32 = arith.constant 0 : i32
    return %arg0, %arg1 : i32, i32
  }
}

</mosaic_0001>

<bundles_post_ra>
// kernel: tpu_custom_call.1
= control target key start
LH: loop header
LB: loop body
LE: loop exit
PB: predicated region body
PF: predicated region fallthrough
CT: control target
= control target key end

     0   :  { %v2474_v1 = vmov 0   ;;  %s3347_s0 = inlined_call_operand.vmem [shape: f32[8,1], index: 0, kind: input, shape index: {}]   ;;  %s3348_s1 = inlined_call_operand.vmem [shape: f32[1,64], index: 1, kind: input, shape index: {}]   ;;  %s3349_s2 = inlined_call_operand.vmem [shape: f32[1,64], index: 2, kind: input, shape index: {}]   ;;  %s3350_s3 = inlined_call_operand.hbm [shape: f32[8,128], index: 3, kind: output, shape index: {}]  }
   0x1   :  { %v15_v0 = vld [vmem:[%s3347_s0] sm:$0xff]  ;;  %2441 = vset.pattern.permute.xlu0 %v2474_v1 }
   0x2   :  { %19 = vperm.xlu0 %2441, %v15_v0  }
   0x3   :  { %8 = vsyncpa [#allocation3], 0  ;;  %v2350_v2 = vld [vmem:[%s3348_s1] ss:$0 sm:$0xff]  ;;  %v2475_v29 = vmov 683565275  }
   0x4   :  { %v2355_v3 = vld [vmem:[%s3349_s2] ss:$0 sm:$0xff]  ;;  %v2476_v31 = vmov 2475754826   ;;  %v2477_v34 = vmov 2131351028  }
   0x5   :  { %v2478_v36 = vmov 2102212464   ;;  %v2479_v38 = vmov 920167782   ;;  %v2480_v45 = vmov 1326507024  }
   0x6   :  { %s2483_s0 = smov 4   ;;  %s2484_s1 = smov 2  }
   0x7   :  { %s2485_s2 = smov 8   ;;  %s2486_s18 = smov 6  }
   0x8   :  { %s2487_s19 = smov 12   ;;  %s2488_s20 = smov 10  }
   0x9   :  { %s2489_s21 = smov 14   ;;  %s2490_s22 = smov 16  }
   0xa   :  { %s2491_s23 = smov 18   ;;  %s2492_s24 = smov 20  }
   0xb   :  { %s2493_s25 = smov 22   ;;  %s2494_s26 = smov 24  }
   0xc   :  { %s2495_s27 = smov 26   ;;  %s2496_s28 = smov 28  }
   0xd   :  { %s2497_s29 = smov 30   ;;  %s2498_s30 = smov 32  }
   0xe   :  { %s2499_s4 = smov 34   ;;  %s2500_s5 = smov 36  }
   0xf   :  { %s2501_s6 = smov 38   ;;  %s2502_s7 = smov 40  }
  0x10   :  { %s2503_s8 = smov 42   ;;  %s2504_s9 = smov 44  }
  0x11   :  { %s2505_s10 = smov 46   ;;  %s2506_s11 = smov 48  }
  0x12   :  { %s2507_s12 = smov 50   ;;  %s2508_s13 = smov 52  }
  0x13   :  { %s2509_s14 = smov 54   ;;  %s2510_s15 = smov 56  }
  0x14   :  { %s2511_s16 = smov 58   ;;  %s2512_s17 = smov 60  }
  0x81   :  { %v20_v4 = vpop.permute.xlu0 %19 }
  0x82   :  { %v2576_v5 = vmul.f32 %v2350_v2, %v20_v4  ;;  %v2578_v6 = vmul.f32 %v2355_v3, %v20_v4 }
  0x84   :  { %v29_v7 = vand.u32 2147483647, %v2576_v5  ;;  %v32_v8 = vand.u32 2139095040, %v2576_v5  ;;  %v140_v9 = vand.u32 2147483647, %v2578_v6  ;;  %v143_v10 = vand.u32 2139095040, %v2578_v6 }
  0x85   :  { %vm31_vm14 = vcmp.lt.s32.totalorder %v2576_v5, 0 }
  0x86   :  { %v33_v11 = vshrl.u32 %v32_v8, 23  ;;  %v36_v12 = vand.u32 8388607, %v29_v7  ;;  %v144_v13 = vshrl.u32 %v143_v10, 23  ;;  %v147_v14 = vand.u32 8388607, %v140_v9 }
  0x87   :  { %vm2642_vm15 = vcmp.le.f32.partialorder %v29_v7, 0.7853982 }
  0x88   :  { %v2351_v15 = vadd.s32 4294967169, %v33_v11  ;;  %v2356_v16 = vadd.s32 4294967169, %v144_v13  ;;  %v37_v18 = vor.u32 8388608, %v36_v12  ;;  %v148_v19 = vor.u32 8388608, %v147_v14 }
  0x8a   :  { %v39_v17 = vadd.s32 1, %v2351_v15  ;;  %v150_v20 = vadd.s32 1, %v2356_v16  ;;  %v2588_v25 = vshll.u32 %v37_v18, 8  ;;  %v2592_v27 = vshll.u32 %v148_v19, 8 }
  0x8c   :  { %vm40_vm0 = vcmp.gt.s32.totalorder %v39_v17, 0  ;;  %vm151_vm1 = vcmp.gt.s32.totalorder %v150_v20, 0 }
  0x8d   :  { %v41_v21 = vsel %vm40_vm0, %v39_v17, 0  ;;  %v152_v24 = vsel %vm151_vm1, %v150_v20, 0  ;;  %vm142_vm0 = vcmp.lt.s32.totalorder %v2578_v6, 0  ;;  %vm2654_vm1 = vcmp.le.f32.partialorder %v140_v9, 0.7853982 }
  0x8e   :  { %v42_v22 = vshrl.u32 %v41_v21, 5  ;;  %v43_v23 = vand.u32 31, %v41_v21  ;;  %v2590_v26 = vshrl.u32 %v152_v24, 5  ;;  %v154_v33 = vand.u32 31, %v152_v24 }
  0x90   :  { %v44_v28 = vsub.s32 32, %v43_v23  ;;  %v46_v30 = vshll.u32 %v2475_v29, %v43_v23  ;;  %v49_v32 = vshll.u32 %v2476_v31, %v43_v23  ;;  %v52_v35 = vshll.u32 %v2477_v34, %v43_v23 }
  0x91   :  { %v55_v37 = vshll.u32 %v2478_v36, %v43_v23  ;;  %v58_v39 = vshll.u32 %v2479_v38, %v43_v23  ;;  %vm61_vm2 = vcmp.lt.s32.totalorder %v42_v22, 1  ;;  %vm62_vm3 = vcmp.lt.s32.totalorder %v42_v22, 2 }
  0x92   :  { %v47_v40 = vshrl.u32 %v2476_v31, %v44_v28  ;;  %v50_v41 = vshrl.u32 %v2477_v34, %v44_v28  ;;  %v53_v42 = vshrl.u32 %v2478_v36, %v44_v28  ;;  %v45_v43 = vshrl.u32 %v2475_v29, %v44_v28 }
  0x93   :  { %v56_v44 = vshrl.u32 %v2479_v38, %v44_v28  ;;  %v59_v46 = vshrl.u32 %v2480_v45, %v44_v28  ;;  %vm63_vm4 = vcmp.lt.s32.totalorder %v42_v22, 3  ;;  %v155_v50 = vsub.s32 32, %v154_v33 }
  0x94   :  { %v48_v47 = vor.u32 %v47_v40, %v46_v30  ;;  %v51_v48 = vor.u32 %v50_v41, %v49_v32  ;;  %v54_v49 = vor.u32 %v53_v42, %v52_v35  ;;  %vm64_vm5 = vcmp.lt.s32.totalorder %v42_v22, 4 }
  0x95   :  { %v57_v51 = vor.u32 %v56_v44, %v55_v37  ;;  %v60_v52 = vor.u32 %v59_v46, %v58_v39  ;;  %v157_v53 = vshll.u32 %v2475_v29, %v154_v33  ;;  %v160_v61 = vshll.u32 %v2476_v31, %v154_v33 }
  0x96   :  { %v65_v54 = vsel %vm61_vm2, %v45_v43, %v48_v47  ;;  %v66_v55 = vsel %vm64_vm5, %v54_v49, 2102212464  ;;  %v69_v56 = vsel %vm61_vm2, %v48_v47, %v51_v48  ;;  %v73_v57 = vsel %vm61_vm2, %v51_v48, %v54_v49 }
  0x97   :  { %v67_v58 = vsel %vm63_vm4, %v51_v48, %v66_v55  ;;  %v70_v59 = vsel %vm64_vm5, %v57_v51, 920167782  ;;  %v74_v60 = vsel %vm64_vm5, %v60_v52, 1326507024  ;;  %v156_v0 = vshrl.u32 %v2475_v29, %v155_v50 }
  0x98   :  { %v71_v62 = vsel %vm63_vm4, %v54_v49, %v70_v59  ;;  %v75_v63 = vsel %vm63_vm4, %v57_v51, %v74_v60  ;;  %v158_v1 = vshrl.u32 %v2476_v31, %v155_v50  ;;  %v68_v2 = vsel %vm62_vm3, %v65_v54, %v67_v58 }
  0x99   :  { %v72_v3 = vsel %vm62_vm3, %v69_v56, %v71_v62  ;;  %v76_v4 = vsel %vm62_vm3, %v73_v57, %v75_v63  ;;  %v161_v8 = vshrl.u32 %v2477_v34, %v155_v50  ;;  %v163_v16 = vshll.u32 %v2477_v34, %v154_v33 }
  0x9a   :  { %v2604_v10 = vmul.u32.u64.low %v2588_v25, %v76_v4  ;;  %v2605_v11 = vmul.u32.u64.high %v2588_v25, %v76_v4, %v2604_v10  ;;  %v2608_v12 = vmul.u32.u64.low %v2588_v25, %v72_v3  ;;  %v2609_v13 = vmul.u32.u64.high %v2588_v25, %v72_v3, %v2608_v12 }
  0x9b   :  { %v159_v14 = vor.u32 %v158_v1, %v157_v53  ;;  %v162_v15 = vor.u32 %v161_v8, %v160_v61  ;;  %v164_v17 = vshrl.u32 %v2478_v36, %v155_v50  ;;  %v84_v18 = vmul.u32 %v2588_v25, %v68_v2 }
  0x9c   :  { %v166_v19 = vshll.u32 %v2478_v36, %v154_v33  ;;  %v167_v20 = vshrl.u32 %v2479_v38, %v155_v50  ;;  %v170_v21 = vshrl.u32 %v2480_v45, %v155_v50  ;;  %v169_v23 = vshll.u32 %v2479_v38, %v154_v33 }
  0x9d   :  { %v165_v22 = vor.u32 %v164_v17, %v163_v16  ;;  %vm172_vm6 = vcmp.lt.s32.totalorder %v2590_v26, 1  ;;  %vm173_vm7 = vcmp.lt.s32.totalorder %v2590_v26, 2  ;;  %vm86_vm8 = vc.u32 %v2605_v11, %v2608_v12 }
  0x9e   :  { %v87_v24 = vadd.s32 1, %v2609_v13  ;;  %v168_v28 = vor.u32 %v167_v20, %v166_v19  ;;  %vm174_vm9 = vcmp.lt.s32.totalorder %v2590_v26, 3  ;;  %v171_v29 = vor.u32 %v170_v21, %v169_v23 }
  0x9f   :  { %vm175_vm10 = vcmp.lt.s32.totalorder %v2590_v26, 4  ;;  %v176_v25 = vsel %vm172_vm6, %v156_v0, %v159_v14  ;;  %v180_v30 = vsel %vm172_vm6, %v159_v14, %v162_v15  ;;  %v184_v34 = vsel %vm172_vm6, %v162_v15, %v165_v22 }
  0xa0   :  { %v88_v31 = vsel %vm86_vm8, %v87_v24, %v2609_v13  ;;  %v177_v32 = vsel %vm175_vm10, %v165_v22, 2102212464  ;;  %v181_v33 = vsel %vm175_vm10, %v168_v28, 920167782  ;;  %v185_v38 = vsel %vm175_vm10, %v171_v29, 1326507024 }
  0xa1   :  { %v89_v35 = vadd.s32 %v88_v31, %v84_v18  ;;  %v178_v36 = vsel %vm174_vm9, %v162_v15, %v177_v32  ;;  %v182_v37 = vsel %vm174_vm9, %v165_v22, %v181_v33  ;;  %v186_v41 = vsel %vm174_vm9, %v168_v28, %v185_v38 }
  0xa2   :  { %v179_v39 = vsel %vm173_vm7, %v176_v25, %v178_v36  ;;  %v183_v40 = vsel %vm173_vm7, %v180_v30, %v182_v37  ;;  %v187_v43 = vsel %vm173_vm7, %v184_v34, %v186_v41  ;;  %vm121_vm5 = vweird.f32 %v2576_v5 }
  0xa3   :  { %v90_v42 = vadd.s32 536870912, %v89_v35  ;;  %v2626_v44 = vmul.u32.u64.low %v2592_v27, %v183_v40  ;;  %v2627_v45 = vmul.u32.u64.high %v2592_v27, %v183_v40, %v2626_v44  ;;  %v195_v51 = vmul.u32 %v2592_v27, %v179_v39 }
  0xa4   :  { %v2630_v46 = vmul.u32.u64.low %v2592_v27, %v187_v43  ;;  %v2631_v47 = vmul.u32.u64.high %v2592_v27, %v187_v43, %v2630_v46  ;;  %v85_v27 = vadd.s32 %v2608_v12, %v2605_v11  ;;  %v244_v40 = vlaneseq }
  0xa5   :  { %v91_v48 = vshrl.u32 %v90_v42, 30  ;;  %v198_v50 = vadd.s32 1, %v2627_v45  ;;  %vm232_vm9 = vweird.f32 %v2578_v6  ;;  %vm804_vm10 = vcmask 7168  }
  0xa6   :  { %v196_v52 = vadd.s32 %v2626_v44, %v2631_v47  ;;  %vm197_vm11 = vc.u32 %v2631_v47, %v2626_v44  ;;  %v2661_v47 = vshrl.u32 %v244_v40, 7 }
  0xa7   :  { %v92_v49 = vshll.u32 %v91_v48, 30  ;;  %v199_v53 = vsel %vm197_vm11, %v198_v50, %v2627_v45  ;;  %v115_v32 = vsub.s32 4, %v91_v48  ;;  %vm2209_vm11 = vcmask 15360  }
  0xa8   :  { %v200_v54 = vadd.s32 %v199_v53, %v195_v51 }
  0xa9   :  { %v93_v26 = vsub.s32 %v89_v35, %v92_v49  ;;  %v116_v37 = vsel %vm31_vm14, %v115_v32, %v91_v48 }
  0xaa   :  { %v201_v56 = vadd.s32 536870912, %v200_v54  ;;  %v118_v7 = vsel %vm2642_vm15, 0, %v116_v37 }
  0xab   :  { %v95_v55 = vsub.s32 0, %v93_v26  ;;  %v122_v45 = vand.u32 3, %v118_v7 }
  0xac   :  { %v202_v58 = vshrl.u32 %v201_v56, 30 }
  0xad   :  { %v2352_v57 = vmin.u32 %v95_v55, %v93_v26  ;;  %vm127_vm2 = vcmp.eq.s32.totalorder %v122_v45, 2  ;;  %vm124_vm3 = vcmp.eq.s32.totalorder %v122_v45, 0  ;;  %v421_v55 = vsub.s32 5, %v2661_v47 }
  0xae   :  { %v203_v60 = vshll.u32 %v202_v58, 30  ;;  %v226_v39 = vsub.s32 4, %v202_v58  ;;  %vm123_vm4 = vcmp.lt.s32.totalorder %v122_v45, 2 }
  0xaf   :  { %v97_v59 = vclz %v2352_v57  ;;  %v456_v57 = vsub.s32 6, %v2661_v47 }
  0xb0   :  { %v204_v62 = vsub.s32 %v200_v54, %v203_v60  ;;  %v227_v44 = vsel %vm142_vm0, %v226_v39, %v202_v58  ;;  %v491_v58 = vsub.s32 7, %v2661_v47 }
  0xb1   :  { %v2353_v61 = vadd.s32 4294967294, %v97_v59  ;;  %v229_v49 = vsel %vm2654_vm1, 0, %v227_v44 }
  0xb2   :  { %v206_v0 = vsub.s32 0, %v204_v62  ;;  %v233_v54 = vadd.s32 3, %v229_v49 }
  0xb3   :  { %vm2354_vm12 = vcmp.lt.s32.totalorder %v2353_v61, 0 }
  0xb4   :  { %v100_v63 = vsel %vm2354_vm12, 0, %v2353_v61  ;;  %v2357_v3 = vmin.u32 %v206_v0, %v204_v62  ;;  %v234_v61 = vand.u32 3, %v233_v54  ;;  %vm2211_vm12 = vcmask 31744  }
  0xb5   :  { %v101_v1 = vsub.s32 32, %v100_v63  ;;  %v105_v2 = vsub.s32 4294967266, %v100_v63  ;;  %v102_v4 = vshll.u32 %v93_v26, %v100_v63  ;;  %v386_v26 = vsub.s32 4, %v2661_v47 }
  0xb6   :  { %v208_v13 = vclz %v2357_v3  ;;  %vm239_vm6 = vcmp.eq.s32.totalorder %v234_v61, 2  ;;  %vm236_vm7 = vcmp.eq.s32.totalorder %v234_v61, 0  ;;  %vm235_vm8 = vcmp.lt.s32.totalorder %v234_v61, 2 }
  0xb7   :  { %v103_v8 = vshrl.u32 %v85_v27, %v101_v1  ;;  %v106_v10 = vadd.s32 127, %v105_v2 }
  0xb8   :  { %v2358_v16 = vadd.s32 4294967294, %v208_v13  ;;  %v316_v13 = vsub.s32 2, %v2661_v47 }
  0xb9   :  { %v104_v14 = vor.u32 %v103_v8, %v102_v4  ;;  %v107_v15 = vshll.u32 %v106_v10, 23 }
  0xba   :  { %vm2359_vm13 = vcmp.lt.s32.totalorder %v2358_v16, 0 }
  0xbb   :  { %v108_v17 = vor.u32 4788187, %v107_v15  ;;  %v111_v19 = vcvt.s32.f32 %v104_v14  ;;  %v211_v20 = vsel %vm2359_vm13, 0, %v2358_v16  ;;  %v351_v14 = vsub.s32 3, %v2661_v47 }
  0xbc   :  { %v212_v21 = vsub.s32 32, %v211_v20  ;;  %v216_v22 = vsub.s32 4294967266, %v211_v20  ;;  %v213_v24 = vshll.u32 %v204_v62, %v211_v20  ;;  %vm2213_vm13 = vcmask 48128  }
  0xbd   :  { %v109_v18 = vand.u32 2147483647, %v108_v17 }
  0xbe   :  { %v214_v11 = vshrl.u32 %v196_v52, %v212_v21  ;;  %v217_v12 = vadd.s32 127, %v216_v22  ;;  %v246_v52 = vsub.s32 0, %v2661_v47 }
  0xbf   :  { %v112_v23 = vmul.f32 %v111_v19, %v109_v18 }
  0xc0   :  { %v215_v29 = vor.u32 %v214_v11, %v213_v24  ;;  %v218_v25 = vshll.u32 %v217_v12, 23 }
  0xc1   :  { %v113_v28 = vxor.u32 2147483648, %v112_v23 }
  0xc2   :  { %v219_v34 = vor.u32 4788187, %v218_v25  ;;  %v222_v36 = vcvt.s32.f32 %v215_v29 }
  0xc3   :  { %v114_v31 = vsel %vm31_vm14, %v113_v28, %v112_v23  ;;  %vm2215_vm14 = vcmask 64512  }
  0xc4   :  { %v117_v33 = vsel %vm2642_vm15, %v2576_v5, %v114_v31  ;;  %v220_v35 = vand.u32 2147483647, %v219_v34  ;;  %v281_v5 = vsub.s32 1, %v2661_v47  ;;  %vm2217_vm15 = vcmask 80896  }
  0xc5   :  { %2442 = vcosq.f32 %v117_v33 }
  0xc6   :  { %2444 = vsinq.f32 %v117_v33  ;;  %v223_v38 = vmul.f32 %v222_v36, %v220_v35 }
  0xc8   :  { %v224_v41 = vxor.u32 2147483648, %v223_v38 }
  0xca   :  { %v225_v43 = vsel %vm142_vm0, %v224_v41, %v223_v38  ;;  %vm2219_vm0 = vcmask 97280  }
  0xcb   :  { %v228_v46 = vsel %vm2654_vm1, %v2578_v6, %v225_v43  ;;  %vm2221_vm1 = vcmask 113664  }
  0xcc   :  { %2446 = vcosq.f32 %v228_v46 }
  0xcd   :  { %2448 = vsinq.f32 %v228_v46 }
  0xcf   :  { %v2443_v48 = vpop.eup %2442 }
  0xd0   :  { %v2445_v50 = vpop.eup %2444  ;;  %v128_v9 = vxor.u32 2147483648, %v2443_v48 }
  0xd1   :  { %v125_v51 = vxor.u32 2147483648, %v2445_v50 }
  0xd2   :  { %v129_v53 = vsel %vm127_vm2, %v128_v9, %v2445_v50  ;;  %vm2223_vm2 = vcmask 130048  }
  0xd3   :  { %v126_v56 = vsel %vm124_vm3, %v2443_v48, %v125_v51  ;;  %vm2225_vm3 = vcmask 146432  }
  0xd4   :  { %v130_v59 = vsel %vm123_vm4, %v126_v56, %v129_v53  ;;  %vm2227_vm4 = vcmask 162816  }
  0xd5   :  { %v131_v60 = vsel %vm121_vm5, nan, %v130_v59  ;;  %vm2229_vm5 = vcmask 179200  }
  0xd6   :  { %v247_v62 = vrot.slane %v131_v60, %v246_v52  ;;  %v2671_v63 = vrot.slane %v131_v60, %v386_v26  ;;  %v2673_v0 = vrot.slane %v131_v60, %v421_v55  ;;  %v2675_v27 = vrot.slane %v131_v60, %v456_v57  ;;  %v2447_v2 = vpop.eup %2446 }
  0xd7   :  { %v2677_v1 = vrot.slane %v131_v60, %v491_v58  ;;  %v2449_v3 = vpop.eup %2448  ;;  %v240_v4 = vxor.u32 2147483648, %v2447_v2  ;;  %v282_v6 = vrot.slane %v131_v60, %v281_v5  ;;  %v317_v12 = vrot.slane %v131_v60, %v316_v13 }
  0xd8   :  { %253 = vbcast.lane.b32.xlu1 %v247_v62, 264  ;;  %249 = vbcast.lane.b32.xlu0 %v247_v62, 256  ;;  %v237_v8 = vxor.u32 2147483648, %v2449_v3  ;;  %v352_v28 = vrot.slane %v131_v60, %v351_v14 }
  0xd9   :  { %v241_v10 = vsel %vm239_vm6, %v240_v4, %v2449_v3  ;;  %vm2231_vm6 = vcmask 195584  }
  0xda   :  { %v238_v15 = vsel %vm236_vm7, %v2447_v2, %v237_v8  ;;  %vm2233_vm7 = vcmask 211968  }
  0xdb   :  { %v242_v16 = vsel %vm235_vm8, %v238_v15, %v241_v10  ;;  %vm2235_vm8 = vcmask 228352  }
  0xdc   :  { %257 = vbcast.lane.b32.xlu1 %v247_v62, 272  ;;  %261 = vbcast.lane.b32.xlu0 %v247_v62, 280  ;;  %v243_v17 = vsel %vm232_vm9, nan, %v242_v16  ;;  %vm2237_vm9 = vcmask 244736  }
  0xdd   :  { %v2683_v18 = vrot.slane %v243_v17, %v246_v52  ;;  %v2685_v19 = vrot.slane %v243_v17, %v281_v5  ;;  %v2687_v20 = vrot.slane %v243_v17, %v316_v13  ;;  %v2689_v21 = vrot.slane %v243_v17, %v351_v14 }
  0xde   :  { %v2691_v22 = vrot.slane %v243_v17, %v386_v26  ;;  %v2693_v23 = vrot.slane %v243_v17, %v421_v55  ;;  %v2695_v24 = vrot.slane %v243_v17, %v456_v57  ;;  %v2697_v11 = vrot.slane %v243_v17, %v491_v58 }
  0xe0   :  { %265 = vbcast.lane.b32.xlu1 %v247_v62, 288  ;;  %269 = vbcast.lane.b32.xlu0 %v247_v62, 296 }
  0xe4   :  { %273 = vbcast.lane.b32.xlu1 %v247_v62, 304  ;;  %277 = vbcast.lane.b32.xlu0 %v247_v62, 312 }
  0xe8   :  { %284 = vbcast.lane.b32.xlu1 %v282_v6, 256  ;;  %288 = vbcast.lane.b32.xlu0 %v282_v6, 264 }
  0xec   :  { %292 = vbcast.lane.b32.xlu1 %v282_v6, 272  ;;  %296 = vbcast.lane.b32.xlu0 %v282_v6, 280 }
  0xf0   :  { %300 = vbcast.lane.b32.xlu1 %v282_v6, 288  ;;  %304 = vbcast.lane.b32.xlu0 %v282_v6, 296 }
  0xf4   :  { %308 = vbcast.lane.b32.xlu1 %v282_v6, 304  ;;  %312 = vbcast.lane.b32.xlu0 %v282_v6, 312 }
  0xf8   :  { %319 = vbcast.lane.b32.xlu1 %v317_v12, 256  ;;  %323 = vbcast.lane.b32.xlu0 %v317_v12, 264 }
  0xfc   :  { %327 = vbcast.lane.b32.xlu1 %v317_v12, 272  ;;  %331 = vbcast.lane.b32.xlu0 %v317_v12, 280 }
 0x100   :  { %335 = vbcast.lane.b32.xlu1 %v317_v12, 288  ;;  %339 = vbcast.lane.b32.xlu0 %v317_v12, 296 }
 0x104   :  { %343 = vbcast.lane.b32.xlu1 %v317_v12, 304  ;;  %347 = vbcast.lane.b32.xlu0 %v317_v12, 312 }
 0x108   :  { %354 = vbcast.lane.b32.xlu1 %v352_v28, 256  ;;  %358 = vbcast.lane.b32.xlu0 %v352_v28, 264 }
 0x10c   :  { %362 = vbcast.lane.b32.xlu1 %v352_v28, 272  ;;  %366 = vbcast.lane.b32.xlu0 %v352_v28, 280 }
 0x110   :  { %370 = vbcast.lane.b32.xlu1 %v352_v28, 288  ;;  %374 = vbcast.lane.b32.xlu0 %v352_v28, 296 }
 0x114   :  { %378 = vbcast.lane.b32.xlu1 %v352_v28, 304  ;;  %382 = vbcast.lane.b32.xlu0 %v352_v28, 312 }
 0x118   :  { %389 = vbcast.lane.b32.xlu1 %v2671_v63, 256  ;;  %393 = vbcast.lane.b32.xlu0 %v2671_v63, 264 }
 0x11c   :  { %397 = vbcast.lane.b32.xlu1 %v2671_v63, 272  ;;  %401 = vbcast.lane.b32.xlu0 %v2671_v63, 280 }
 0x120   :  { %405 = vbcast.lane.b32.xlu1 %v2671_v63, 288  ;;  %409 = vbcast.lane.b32.xlu0 %v2671_v63, 296 }
 0x124   :  { %413 = vbcast.lane.b32.xlu1 %v2671_v63, 304  ;;  %417 = vbcast.lane.b32.xlu0 %v2671_v63, 312 }
 0x128   :  { %424 = vbcast.lane.b32.xlu1 %v2673_v0, 256  ;;  %428 = vbcast.lane.b32.xlu0 %v2673_v0, 264 }
 0x12c   :  { %432 = vbcast.lane.b32.xlu1 %v2673_v0, 272  ;;  %436 = vbcast.lane.b32.xlu0 %v2673_v0, 280 }
 0x130   :  { %440 = vbcast.lane.b32.xlu1 %v2673_v0, 288  ;;  %444 = vbcast.lane.b32.xlu0 %v2673_v0, 296 }
 0x134   :  { %448 = vbcast.lane.b32.xlu1 %v2673_v0, 304  ;;  %452 = vbcast.lane.b32.xlu0 %v2673_v0, 312 }
 0x138   :  { %459 = vbcast.lane.b32.xlu1 %v2675_v27, 256  ;;  %463 = vbcast.lane.b32.xlu0 %v2675_v27, 264 }
 0x13c   :  { %467 = vbcast.lane.b32.xlu1 %v2675_v27, 272  ;;  %471 = vbcast.lane.b32.xlu0 %v2675_v27, 280 }
 0x140   :  { %475 = vbcast.lane.b32.xlu1 %v2675_v27, 288  ;;  %479 = vbcast.lane.b32.xlu0 %v2675_v27, 296 }
 0x144   :  { %483 = vbcast.lane.b32.xlu1 %v2675_v27, 304  ;;  %487 = vbcast.lane.b32.xlu0 %v2675_v27, 312 }
 0x148   :  { %494 = vbcast.lane.b32.xlu1 %v2677_v1, 256  ;;  %498 = vbcast.lane.b32.xlu0 %v2677_v1, 264 }
 0x14a   :  { %v2725_v29 = vpop.permute.xlu1 %253  ;;  %v2727_v25 = vpop.permute.xlu0 %249 }
 0x14c   :  { %502 = vbcast.lane.b32.xlu1 %v2677_v1, 272  ;;  %506 = vbcast.lane.b32.xlu0 %v2677_v1, 280 }
 0x14e   :  { %v2731_v30 = vpop.permute.xlu1 %257  ;;  %v2733_v31 = vpop.permute.xlu0 %261 }
 0x14f   :  { %3355 = vst [vmem:[#allocation5_spill] sm:$0xff] %v2733_v31 }
 0x150   :  { %510 = vbcast.lane.b32.xlu1 %v2677_v1, 288  ;;  %514 = vbcast.lane.b32.xlu0 %v2677_v1, 296 }
 0x152   :  { %v2737_v32 = vpop.permute.xlu1 %265  ;;  %v2739_v33 = vpop.permute.xlu0 %269 }
 0x153   :  { %3356 = vst [vmem:[#allocation6_spill] sm:$0xff] %v2737_v32  ;;  %3357 = vst [vmem:[#allocation7_spill] sm:$0xff] %v2739_v33 }
 0x154   :  { %518 = vbcast.lane.b32.xlu1 %v2677_v1, 304  ;;  %522 = vbcast.lane.b32.xlu0 %v2677_v1, 312 }
 0x156   :  { %v2743_v34 = vpop.permute.xlu1 %273  ;;  %v2745_v35 = vpop.permute.xlu0 %277 }
 0x157   :  { %3358 = vst [vmem:[#allocation8_spill] sm:$0xff] %v2743_v34  ;;  %3359 = vst [vmem:[#allocation9_spill] sm:$0xff] %v2745_v35 }
 0x158   :  { %529 = vbcast.lane.b32.xlu1 %v2683_v18, 256  ;;  %533 = vbcast.lane.b32.xlu0 %v2683_v18, 264 }
 0x15a   :  { %v2749_v36 = vpop.permute.xlu1 %284  ;;  %v2751_v37 = vpop.permute.xlu0 %288 }
 0x15c   :  { %537 = vbcast.lane.b32.xlu1 %v2683_v18, 272  ;;  %541 = vbcast.lane.b32.xlu0 %v2683_v18, 280 }
 0x15e   :  { %v2755_v38 = vpop.permute.xlu1 %292  ;;  %v2757_v39 = vpop.permute.xlu0 %296 }
 0x15f   :  { %3360 = vst [vmem:[#allocation10_spill] sm:$0xff] %v2757_v39 }
 0x160   :  { %545 = vbcast.lane.b32.xlu1 %v2683_v18, 288  ;;  %549 = vbcast.lane.b32.xlu0 %v2683_v18, 296 }
 0x162   :  { %v2761_v40 = vpop.permute.xlu1 %300  ;;  %v2763_v7 = vpop.permute.xlu0 %304 }
 0x163   :  { %3361 = vst [vmem:[#allocation11_spill] sm:$0xff] %v2761_v40  ;;  %3362 = vst [vmem:[#allocation12_spill] sm:$0xff] %v2763_v7 }
 0x164   :  { %553 = vbcast.lane.b32.xlu1 %v2683_v18, 304  ;;  %557 = vbcast.lane.b32.xlu0 %v2683_v18, 312 }
 0x166   :  { %v2767_v41 = vpop.permute.xlu1 %308  ;;  %v2769_v42 = vpop.permute.xlu0 %312 }
 0x167   :  { %3363 = vst [vmem:[#allocation13_spill] sm:$0xff] %v2767_v41  ;;  %3364 = vst [vmem:[#allocation14_spill] sm:$0xff] %v2769_v42 }
 0x168   :  { %564 = vbcast.lane.b32.xlu1 %v2685_v19, 256  ;;  %568 = vbcast.lane.b32.xlu0 %v2685_v19, 264 }
 0x16a   :  { %v2773_v43 = vpop.permute.xlu1 %319  ;;  %v2775_v44 = vpop.permute.xlu0 %323 }
 0x16c   :  { %572 = vbcast.lane.b32.xlu1 %v2685_v19, 272  ;;  %576 = vbcast.lane.b32.xlu0 %v2685_v19, 280 }
 0x16e   :  { %v2779_v45 = vpop.permute.xlu1 %327  ;;  %v2781_v46 = vpop.permute.xlu0 %331 }
 0x170   :  { %580 = vbcast.lane.b32.xlu1 %v2685_v19, 288  ;;  %584 = vbcast.lane.b32.xlu0 %v2685_v19, 296 }
 0x172   :  { %v2785_v48 = vpop.permute.xlu1 %335  ;;  %v2787_v49 = vpop.permute.xlu0 %339 }
 0x173   :  { %3365 = vst [vmem:[#allocation15_spill] sm:$0xff] %v2785_v48  ;;  %3366 = vst [vmem:[#allocation16_spill] sm:$0xff] %v2787_v49 }
 0x174   :  { %588 = vbcast.lane.b32.xlu1 %v2685_v19, 304  ;;  %592 = vbcast.lane.b32.xlu0 %v2685_v19, 312 }
 0x176   :  { %v2791_v50 = vpop.permute.xlu1 %343  ;;  %v2793_v9 = vpop.permute.xlu0 %347 }
 0x177   :  { %3367 = vst [vmem:[#allocation17_spill] sm:$0xff] %v2791_v50  ;;  %3368 = vst [vmem:[#allocation18_spill] sm:$0xff] %v2793_v9 }
 0x178   :  { %599 = vbcast.lane.b32.xlu1 %v2687_v20, 256  ;;  %603 = vbcast.lane.b32.xlu0 %v2687_v20, 264 }
 0x17a   :  { %v2797_v51 = vpop.permute.xlu1 %354  ;;  %v2799_v52 = vpop.permute.xlu0 %358 }
 0x17c   :  { %607 = vbcast.lane.b32.xlu1 %v2687_v20, 272  ;;  %611 = vbcast.lane.b32.xlu0 %v2687_v20, 280 }
 0x17e   :  { %v2803_v26 = vpop.permute.xlu1 %362  ;;  %v2805_v53 = vpop.permute.xlu0 %366 }
 0x180   :  { %615 = vbcast.lane.b32.xlu1 %v2687_v20, 288  ;;  %619 = vbcast.lane.b32.xlu0 %v2687_v20, 296 }
 0x182   :  { %v2809_v54 = vpop.permute.xlu1 %370  ;;  %v2811_v55 = vpop.permute.xlu0 %374 }
 0x183   :  { %3369 = vst [vmem:[#allocation19_spill] sm:$0xff] %v2809_v54  ;;  %3370 = vst [vmem:[#allocation20_spill] sm:$0xff] %v2811_v55  ;;  %v2482_v54 = vmov 1934713408  }
 0x184   :  { %623 = vbcast.lane.b32.xlu1 %v2687_v20, 304  ;;  %627 = vbcast.lane.b32.xlu0 %v2687_v20, 312  ;;  %v936_v48 = vunpack.c.l.s4 %v2482_v54 }
 0x186   :  { %v2815_v56 = vpop.permute.xlu1 %378  ;;  %v2817_v57 = vpop.permute.xlu0 %382 }
 0x187   :  { %3371 = vst [vmem:[#allocation21_spill] sm:$0xff] %v2815_v56  ;;  %3372 = vst [vmem:[#allocation22_spill] sm:$0xff] %v2817_v57 }
 0x188   :  { %634 = vbcast.lane.b32.xlu1 %v2689_v21, 256  ;;  %638 = vbcast.lane.b32.xlu0 %v2689_v21, 264 }
 0x18a   :  { %v2821_v58 = vpop.permute.xlu1 %389  ;;  %v2823_v59 = vpop.permute.xlu0 %393 }
 0x18c   :  { %642 = vbcast.lane.b32.xlu1 %v2689_v21, 272  ;;  %646 = vbcast.lane.b32.xlu0 %v2689_v21, 280 }
 0x18e   :  { %v2827_v60 = vpop.permute.xlu1 %397  ;;  %v2829_v61 = vpop.permute.xlu0 %401 }
 0x190   :  { %650 = vbcast.lane.b32.xlu1 %v2689_v21, 288  ;;  %654 = vbcast.lane.b32.xlu0 %v2689_v21, 296 }
 0x192   :  { %v2833_v62 = vpop.permute.xlu1 %405  ;;  %v2835_v63 = vpop.permute.xlu0 %409 }
 0x193   :  { %3373 = vst [vmem:[#allocation23_spill] sm:$0xff] %v2833_v62  ;;  %3374 = vst [vmem:[#allocation24_spill] sm:$0xff] %v2835_v63 }
 0x194   :  { %658 = vbcast.lane.b32.xlu1 %v2689_v21, 304  ;;  %662 = vbcast.lane.b32.xlu0 %v2689_v21, 312 }
 0x196   :  { %v2839_v0 = vpop.permute.xlu1 %413  ;;  %v2841_v27 = vpop.permute.xlu0 %417 }
 0x197   :  { %3375 = vst [vmem:[#allocation25_spill] sm:$0xff] %v2839_v0  ;;  %3376 = vst [vmem:[#allocation26_spill] sm:$0xff] %v2841_v27 }
 0x198   :  { %669 = vbcast.lane.b32.xlu1 %v2691_v22, 256  ;;  %704 = vbcast.lane.b32.xlu0 %v2693_v23, 256 }
 0x19a   :  { %v2845_v1 = vpop.permute.xlu1 %424  ;;  %v2847_v2 = vpop.permute.xlu0 %428 }
 0x19c   :  { %739 = vbcast.lane.b32.xlu1 %v2695_v24, 256  ;;  %774 = vbcast.lane.b32.xlu0 %v2697_v11, 256 }
 0x19e   :  { %v2851_v3 = vpop.permute.xlu1 %432  ;;  %v2853_v4 = vpop.permute.xlu0 %436 }
 0x1a0   :  { %673 = vbcast.lane.b32.xlu1 %v2691_v22, 264  ;;  %708 = vbcast.lane.b32.xlu0 %v2693_v23, 264 }
 0x1a2   :  { %v2857_v8 = vpop.permute.xlu1 %440  ;;  %v2859_v5 = vpop.permute.xlu0 %444 }
 0x1a3   :  { %3377 = vst [vmem:[#allocation27_spill] sm:$0xff] %v2857_v8  ;;  %3378 = vst [vmem:[#allocation28_spill] sm:$0xff] %v2859_v5  ;;  %v2481_v8 = vmov 1983009808  }
 0x1a4   :  { %743 = vbcast.lane.b32.xlu1 %v2695_v24, 264  ;;  %778 = vbcast.lane.b32.xlu0 %v2697_v11, 264 }
 0x1a6   :  { %v2863_v10 = vpop.permute.xlu1 %448  ;;  %v2865_v13 = vpop.permute.xlu0 %452 }
 0x1a7   :  { %3379 = vst [vmem:[#allocation29_spill] sm:$0xff] %v2863_v10  ;;  %3380 = vst [vmem:[#allocation30_spill] sm:$0xff] %v2865_v13 }
 0x1a8   :  { %677 = vbcast.lane.b32.xlu1 %v2691_v22, 272  ;;  %712 = vbcast.lane.b32.xlu0 %v2693_v23, 272 }
 0x1aa   :  { %v2869_v14 = vpop.permute.xlu1 %459  ;;  %v2871_v15 = vpop.permute.xlu0 %463 }
 0x1ac   :  { %747 = vbcast.lane.b32.xlu1 %v2695_v24, 272  ;;  %782 = vbcast.lane.b32.xlu0 %v2697_v11, 272 }
 0x1ae   :  { %v2875_v16 = vpop.permute.xlu1 %467  ;;  %v2877_v17 = vpop.permute.xlu0 %471 }
 0x1b0   :  { %681 = vbcast.lane.b32.xlu1 %v2691_v22, 280  ;;  %716 = vbcast.lane.b32.xlu0 %v2693_v23, 280 }
 0x1b2   :  { %v2881_v18 = vpop.permute.xlu1 %475  ;;  %v2883_v19 = vpop.permute.xlu0 %479 }
 0x1b3   :  { %3381 = vst [vmem:[#allocation31_spill] sm:$0xff] %v2881_v18  ;;  %3382 = vst [vmem:[#allocation32_spill] sm:$0xff] %v2883_v19 }
 0x1b4   :  { %751 = vbcast.lane.b32.xlu1 %v2695_v24, 280  ;;  %786 = vbcast.lane.b32.xlu0 %v2697_v11, 280 }
 0x1b6   :  { %v2887_v20 = vpop.permute.xlu1 %483  ;;  %v2889_v21 = vpop.permute.xlu0 %487 }
 0x1b7   :  { %3383 = vst [vmem:[#allocation33_spill] sm:$0xff] %v2887_v20  ;;  %3384 = vst [vmem:[#allocation34_spill] sm:$0xff] %v2889_v21 }
 0x1b8   :  { %685 = vbcast.lane.b32.xlu1 %v2691_v22, 288  ;;  %720 = vbcast.lane.b32.xlu0 %v2693_v23, 288 }
 0x1ba   :  { %v2893_v6 = vpop.permute.xlu1 %494  ;;  %v2895_v12 = vpop.permute.xlu0 %498 }
 0x1bc   :  { %755 = vbcast.lane.b32.xlu1 %v2695_v24, 288  ;;  %790 = vbcast.lane.b32.xlu0 %v2697_v11, 288 }
 0x1be   :  { %v2899_v28 = vpop.permute.xlu1 %502  ;;  %v2901_v42 = vpop.permute.xlu0 %506 }
 0x1c0   :  { %689 = vbcast.lane.b32.xlu1 %v2691_v22, 296  ;;  %724 = vbcast.lane.b32.xlu0 %v2693_v23, 296 }
 0x1c2   :  { %v2905_v35 = vpop.permute.xlu1 %510  ;;  %v2907_v13 = vpop.permute.xlu0 %514 }
 0x1c3   :  { %3385 = vst [vmem:[#allocation35_spill] sm:$0xff] %v2905_v35  ;;  %3386 = vst [vmem:[#allocation36_spill] sm:$0xff] %v2907_v13 }
 0x1c4   :  { %759 = vbcast.lane.b32.xlu1 %v2695_v24, 296  ;;  %794 = vbcast.lane.b32.xlu0 %v2697_v11, 296 }
 0x1c6   :  { %v2911_v27 = vpop.permute.xlu1 %518  ;;  %v2913_v21 = vpop.permute.xlu0 %522 }
 0x1c7   :  { %3387 = vst [vmem:[#allocation37_spill] sm:$0xff] %v2911_v27  ;;  %3388 = vst [vmem:[#allocation38_spill] sm:$0xff] %v2913_v21 }
 0x1c8   :  { %693 = vbcast.lane.b32.xlu1 %v2691_v22, 304  ;;  %728 = vbcast.lane.b32.xlu0 %v2693_v23, 304 }
 0x1ca   :  { %v530_v57 = vpop.permute.xlu1 %529  ;;  %v2917_v9 = vpop.permute.xlu0 %533 }
 0x1cc   :  { %763 = vbcast.lane.b32.xlu1 %v2695_v24, 304  ;;  %798 = vbcast.lane.b32.xlu0 %v2697_v11, 304 }
 0x1ce   :  { %v2921_v41 = vpop.permute.xlu1 %537  ;;  %v2923_v34 = vpop.permute.xlu0 %541 }
 0x1d0   :  { %697 = vbcast.lane.b32.xlu1 %v2691_v22, 312  ;;  %732 = vbcast.lane.b32.xlu0 %v2693_v23, 312 }
 0x1d2   :  { %v2927_v21 = vpop.permute.xlu1 %545  ;;  %v2929_v10 = vpop.permute.xlu0 %549 }
 0x1d3   :  { %3389 = vst [vmem:[#allocation39_spill] sm:$0xff] %v2927_v21  ;;  %3390 = vst [vmem:[#allocation40_spill] sm:$0xff] %v2929_v10 }
 0x1d4   :  { %767 = vbcast.lane.b32.xlu1 %v2695_v24, 312  ;;  %802 = vbcast.lane.b32.xlu0 %v2697_v11, 312 }
 0x1d6   :  { %v2933_v0 = vpop.permute.xlu1 %553  ;;  %v2935_v56 = vpop.permute.xlu0 %557 }
 0x1d7   :  { %3391 = vst [vmem:[#allocation41_spill] sm:$0xff] %v2933_v0  ;;  %3392 = vst [vmem:[#allocation42_spill] sm:$0xff] %v2935_v56 }
 0x1da   :  { %v565_v27 = vpop.permute.xlu1 %564  ;;  %v569_v20 = vpop.permute.xlu0 %568 }
 0x1de   :  { %v2937_v50 = vpop.permute.xlu1 %572  ;;  %v2939_v7 = vpop.permute.xlu0 %576 }
 0x1df   :  { %3393 = vst [vmem:[#allocation43_spill] sm:$0xff] %v2939_v7 }
 0x1e2   :  { %v2941_v22 = vpop.permute.xlu1 %580  ;;  %v2943_v23 = vpop.permute.xlu0 %584 }
 0x1e3   :  { %3394 = vst [vmem:[#allocation44_spill] sm:$0xff] %v2941_v22  ;;  %3395 = vst [vmem:[#allocation45_spill] sm:$0xff] %v2943_v23 }
 0x1e6   :  { %v2945_v33 = vpop.permute.xlu1 %588  ;;  %v2947_v10 = vpop.permute.xlu0 %592 }
 0x1e7   :  { %3396 = vst [vmem:[#allocation46_spill] sm:$0xff] %v2945_v33  ;;  %3397 = vst [vmem:[#allocation47_spill] sm:$0xff] %v2947_v10 }
 0x1ea   :  { %v600_v24 = vpop.permute.xlu1 %599  ;;  %v604_v11 = vpop.permute.xlu0 %603 }
 0x1ee   :  { %v2949_v5 = vpop.permute.xlu1 %607  ;;  %v2951_v0 = vpop.permute.xlu0 %611 }
 0x1f2   :  { %v2953_v56 = vpop.permute.xlu1 %615  ;;  %v2955_v63 = vpop.permute.xlu0 %619 }
 0x1f3   :  { %3398 = vst [vmem:[#allocation48_spill] sm:$0xff] %v2953_v56  ;;  %3399 = vst [vmem:[#allocation49_spill] sm:$0xff] %v2955_v63 }
 0x1f6   :  { %v2957_v13 = vpop.permute.xlu1 %623  ;;  %v2959_v19 = vpop.permute.xlu0 %627 }
 0x1f7   :  { %3400 = vst [vmem:[#allocation50_spill] sm:$0xff] %v2957_v13  ;;  %3401 = vst [vmem:[#allocation51_spill] sm:$0xff] %v2959_v19  ;;  %v872_v13 = vunpack.c.l.s4 %v2481_v8 }
 0x1f9   :  { %v873_v18 = vunpack.c.0.s8 %v872_v13 }
 0x1fa   :  { %v635_v55 = vpop.permute.xlu1 %634  ;;  %v639_v23 = vpop.permute.xlu0 %638 }
 0x1fb   :  { %v829_v19 = vsel %vm804_vm10, %v2797_v51, %v635_v55  ;;  %v2982_v39 = vsub.s32 %v873_v18, %v2661_v47 }
 0x1fe   :  { %v2961_v49 = vpop.permute.xlu1 %642  ;;  %v2963_v33 = vpop.permute.xlu0 %646 }
 0x202   :  { %v2965_v10 = vpop.permute.xlu1 %650  ;;  %v2967_v40 = vpop.permute.xlu0 %654 }
 0x203   :  { %3402 = vst [vmem:[#allocation52_spill] sm:$0xff] %v2965_v10  ;;  %3403 = vst [vmem:[#allocation53_spill] sm:$0xff] %v2967_v40  ;;  %v813_v40 = vsel %vm804_vm10, %v2749_v36, %v565_v27  ;;  %v805_v10 = vsel %vm804_vm10, %v2727_v25, %v530_v57  ;;  %v937_v36 = vunpack.c.0.s8 %v936_v48 }
 0x204   :  { %v886_v27 = vcombine.high %v813_v40, %v829_v19 }
 0x206   :  { %v2969_v22 = vpop.permute.xlu1 %658  ;;  %v2971_v32 = vpop.permute.xlu0 %662 }
 0x207   :  { %3404 = vst [vmem:[#allocation54_spill] sm:$0xff] %v2969_v22  ;;  %3405 = vst [vmem:[#allocation55_spill] sm:$0xff] %v2971_v32  ;;  %v821_v22 = vsel %vm804_vm10, %v2773_v43, %v600_v24  ;;  %v885_v32 = vcombine.low %v813_v40, %v829_v19  ;;  %v3008_v40 = vsel %vm804_vm10, %v2775_v44, %v604_v11 }
 0x208   :  { %v869_v51 = vcombine.low %v805_v10, %v821_v22  ;;  %v870_v31 = vcombine.high %v805_v10, %v821_v22  ;;  %v3013_v10 = vsel %vm804_vm10, %v2799_v52, %v639_v23 }
 0x209   :  { %v893_v43 = vrot.slane %v885_v32, %v2982_v39  ;;  %v3000_v32 = vsel %vm804_vm10, %v2725_v29, %v2917_v9 }
 0x20a   :  { %v670_v21 = vpop.permute.xlu1 %669  ;;  %v705_v63 = vpop.permute.xlu0 %704  ;;  %v884_v44 = vrot.slane %v870_v31, %v2982_v39 }
 0x20b   :  { %v837_v13 = vsel %vm804_vm10, %v2821_v58, %v670_v21  ;;  %v845_v25 = vsel %vm804_vm10, %v2845_v1, %v705_v63  ;;  %v900_v63 = vrot.slane %v886_v27, %v2982_v39 }
 0x20e   :  { %v740_v62 = vpop.permute.xlu1 %739  ;;  %v775_v35 = vpop.permute.xlu0 %774 }
 0x20f   :  { %v853_v55 = vsel %vm804_vm10, %v2869_v14, %v740_v62  ;;  %v861_v54 = vsel %vm804_vm10, %v2893_v6, %v775_v35  ;;  %v877_v62 = vrot.slane %v869_v51, %v2982_v39  ;;  %v2995_v14 = vsub.s32 %v937_v36, %v2661_v47 }
 0x210   :  { %v901_v57 = vcombine.low %v837_v13, %v853_v55  ;;  %v902_v18 = vcombine.high %v837_v13, %v853_v55  ;;  %v917_v24 = vcombine.low %v845_v25, %v861_v54  ;;  %v918_v7 = vcombine.high %v845_v25, %v861_v54 }
 0x211   :  { %v3004_v35 = vsel %vm804_vm10, %v2751_v37, %v569_v20  ;;  %v933_v1 = vcombine.low %v877_v62, %v893_v43  ;;  %v934_v47 = vcombine.high %v877_v62, %v893_v43  ;;  %v949_v51 = vcombine.low %v884_v44, %v900_v63 }
 0x212   :  { %v674_v8 = vpop.permute.xlu1 %673  ;;  %v709_v56 = vpop.permute.xlu0 %708  ;;  %v909_v29 = vrot.slane %v901_v57, %v2982_v39  ;;  %v916_v9 = vrot.slane %v902_v18, %v2982_v39  ;;  %v925_v37 = vrot.slane %v917_v24, %v2982_v39  ;;  %v932_v19 = vrot.slane %v918_v7, %v2982_v39 }
 0x213   :  { %v838_v20 = vsel %vm804_vm10, %v2823_v59, %v674_v8  ;;  %v846_v11 = vsel %vm804_vm10, %v2847_v2, %v709_v56  ;;  %v1021_v7 = vcombine.low %v3004_v35, %v3013_v10  ;;  %v3031_v59 = vrot.slane %v933_v1, %v2995_v14 }
 0x214   :  { %v965_v6 = vcombine.low %v909_v29, %v925_v37  ;;  %v966_v22 = vcombine.high %v909_v29, %v925_v37  ;;  %v981_v23 = vcombine.low %v916_v9, %v932_v19  ;;  %v1005_v56 = vcombine.low %v3000_v32, %v3008_v40 }
 0x215   :  { %v982_v2 = vcombine.high %v916_v9, %v932_v19  ;;  %v950_v24 = vcombine.high %v884_v44, %v900_v63  ;;  %v957_v62 = vrot.slane %v949_v51, %v2995_v14  ;;  %v1006_v63 = vcombine.high %v3000_v32, %v3008_v40 }
 0x216   :  { %v744_v48 = vpop.permute.xlu1 %743  ;;  %v779_v58 = vpop.permute.xlu0 %778  ;;  %v3035_v8 = vrot.slane %v965_v6, %v2995_v14  ;;  %v989_v36 = vrot.slane %v981_v23, %v2995_v14  ;;  %v1022_v44 = vcombine.high %v3004_v35, %v3013_v10 }
 0x217   :  { %v854_v21 = vsel %vm804_vm10, %v2871_v15, %v744_v48  ;;  %v862_v52 = vsel %vm804_vm10, %v2895_v12, %v779_v58  ;;  %v948_v15 = vrot.slane %v934_v47, %v2995_v14  ;;  %v980_v12 = vrot.slane %v966_v22, %v2995_v14 }
 0x218   :  { %v1037_v31 = vcombine.low %v838_v20, %v854_v21  ;;  %v1053_v55 = vcombine.low %v846_v11, %v862_v52  ;;  %v997_v43 = vcombine.low %v3031_v59, %v3035_v8  ;;  %v998_v57 = vcombine.high %v3031_v59, %v3035_v8 }
 0x219   :  { %v999_v25 = vcombine.low %v948_v15, %v980_v12  ;;  %v1029_v48 = vrot.slane %v1021_v7, %v2982_v39  ;;  %v1013_v58 = vrot.slane %v1005_v56, %v2982_v39  ;;  %v1038_v1 = vcombine.high %v838_v20, %v854_v21 }
 0x21a   :  { %v678_v54 = vpop.permute.xlu1 %677  ;;  %v1045_v27 = vrot.slane %v1037_v31, %v2982_v39  ;;  %v1061_v13 = vrot.slane %v1053_v55, %v2982_v39  ;;  %v713_v18 = vpop.permute.xlu0 %712  ;;  %1958 = vrot.lane.b32.xlu1 %v998_v57, %s2484_s1  ;;  %v1054_v47 = vcombine.high %v846_v11, %v862_v52  ;;  %v996_v29 = vrot.slane %v982_v2, %v2995_v14  ;;  %s2514_s1 = smov 64  }
 0x21b   :  { %1962 = vrot.lane.b32.xlu0 %v999_v25, %s2483_s0  ;;  %v1001_v19 = vcombine.low %v957_v62, %v989_v36  ;;  %v1000_v6 = vcombine.high %v948_v15, %v980_v12  ;;  %v964_v22 = vrot.slane %v950_v24, %v2995_v14  ;;  %v1069_v23 = vcombine.low %v1013_v58, %v1029_v48  ;;  %s2513_s0 = smov 62  }
 0x21c   :  { %v1101_v9 = vcombine.low %v1045_v27, %v1061_v13  ;;  %v1052_v21 = vrot.slane %v1038_v1, %v2982_v39  ;;  %v1068_v52 = vrot.slane %v1054_v47, %v2982_v39  ;;  %v1102_v32 = vcombine.high %v1045_v27, %v1061_v13 }
 0x21d   :  { %v1003_v35 = vcombine.low %v964_v22, %v996_v29  ;;  %v1002_v10 = vcombine.high %v957_v62, %v989_v36  ;;  %v1020_v51 = vrot.slane %v1006_v63, %v2982_v39  ;;  %v3067_v7 = vsel %vm804_vm10, %v2779_v45, %v2949_v5 }
 0x21e   :  { %v748_v37 = vpop.permute.xlu1 %747  ;;  %1966 = vrot.lane.b32.xlu1 %v1000_v6, %s2486_s18  ;;  %v783_v20 = vpop.permute.xlu0 %782  ;;  %v1109_v40 = vrot.slane %v1101_v9, %v2995_v14  ;;  %v1036_v31 = vrot.slane %v1022_v44, %v2982_v39  ;;  %v1070_v15 = vcombine.high %v1013_v58, %v1029_v48  ;;  %v839_v12 = vsel %vm804_vm10, %v2827_v60, %v678_v54  ;;  %s2516_s18 = smov 68  }
 0x21f   :  { %1970 = vrot.lane.b32.xlu0 %v1001_v19, %s2485_s2  ;;  %v3060_v11 = vsel %vm804_vm10, %v2875_v16, %v748_v37  ;;  %v863_v55 = vsel %vm804_vm10, %v2899_v28, %v783_v20  ;;  %v1077_v16 = vrot.slane %v1069_v23, %v2995_v14  ;;  %v831_v45 = vsel %vm804_vm10, %v2803_v26, %v2961_v49  ;;  %s2515_s2 = smov 66  }
 0x220   :  { %v1117_v5 = vcombine.low %v1052_v21, %v1068_v52  ;;  %v847_v56 = vsel %vm804_vm10, %v2851_v3, %v713_v18  ;;  %v1173_v28 = vcombine.low %v839_v12, %v3060_v11  ;;  %v1116_v2 = vrot.slane %v1102_v32, %v2995_v14 }
 0x221   :  { %v1189_v36 = vcombine.low %v847_v56, %v863_v55  ;;  %v1004_v27 = vcombine.high %v964_v22, %v996_v29  ;;  %v1133_v13 = vcombine.low %v1077_v16, %v1109_v40  ;;  %v807_v60 = vsel %vm804_vm10, %v2731_v30, %v2921_v41 }
 0x222   :  { %1974 = vrot.lane.b32.xlu1 %v1002_v10, %s2488_s20  ;;  %v815_v54 = vsel %vm804_vm10, %v2755_v38, %v2937_v50  ;;  %v1084_v49 = vrot.slane %v1070_v15, %v2995_v14  ;;  %v1085_v26 = vcombine.low %v1020_v51, %v1036_v31  ;;  %v682_v3 = vpop.permute.xlu1 %681  ;;  %v1141_v57 = vcombine.low %v807_v60, %v3067_v7  ;;  %v717_v62 = vpop.permute.xlu0 %716  ;;  %s2518_s20 = smov 72  }
 0x223   :  { %1978 = vrot.lane.b32.xlu0 %v1003_v35, %s2487_s19  ;;  %v1157_v25 = vcombine.low %v815_v54, %v831_v45  ;;  %v1118_v18 = vcombine.high %v1052_v21, %v1068_v52  ;;  %v1125_v24 = vrot.slane %v1117_v5, %v2995_v14  ;;  %v1181_v30 = vrot.slane %v1173_v28, %v2982_v39  ;;  %s2517_s19 = smov 70  }
 0x224   :  { %v1197_v41 = vrot.slane %v1189_v36, %v2982_v39  ;;  %v1134_v38 = vcombine.high %v1077_v16, %v1109_v40  ;;  %v1135_v50 = vcombine.low %v1084_v49, %v1116_v2  ;;  %v1086_v48 = vcombine.high %v1020_v51, %v1036_v31 }
 0x225   :  { %v1093_v58 = vrot.slane %v1085_v26, %v2995_v14  ;;  %v1165_v1 = vrot.slane %v1157_v25, %v2982_v39  ;;  %v1149_v47 = vrot.slane %v1141_v57, %v2982_v39  ;;  %v1174_v29 = vcombine.high %v839_v12, %v3060_v11 }
 0x226   :  { %1982 = vrot.lane.b32.xlu1 %v1004_v27, %s2489_s21  ;;  %v1190_v9 = vcombine.high %v847_v56, %v863_v55  ;;  %v1132_v37 = vrot.slane %v1118_v18, %v2995_v14  ;;  %v1237_v19 = vcombine.low %v1181_v30, %v1197_v41  ;;  %v752_v6 = vpop.permute.xlu1 %751  ;;  %v1136_v63 = vcombine.high %v1084_v49, %v1116_v2  ;;  %v787_v52 = vpop.permute.xlu0 %786  ;;  %s2519_s21 = smov 74  }
 0x227   :  { %1986 = vrot.lane.b32.xlu0 %v1133_v13, %s2490_s22  ;;  %v1137_v44 = vcombine.low %v1093_v58, %v1125_v24  ;;  %v1142_v22 = vcombine.high %v807_v60, %v3067_v7  ;;  %v1158_v23 = vcombine.high %v815_v54, %v831_v45  ;;  %v1100_v20 = vrot.slane %v1086_v48, %v2995_v14  ;;  %v3407_v13 = vld [vmem:[#allocation43_spill] sm:$0xff]  ;;  %v3408_v60 = vld [vmem:[#allocation10_spill] sm:$0xff]  ;;  %s2520_s22 = smov 76  }
 0x228   :  { %v1205_v21 = vcombine.low %v1149_v47, %v1165_v1  ;;  %v1188_v11 = vrot.slane %v1174_v29, %v2982_v39  ;;  %v1204_v32 = vrot.slane %v1190_v9, %v2982_v39  ;;  %v3104_v40 = vsel %vm804_vm10, %v2877_v17, %v752_v6 }
 0x229   :  { %v1238_v35 = vcombine.high %v1181_v30, %v1197_v41  ;;  %v1245_v10 = vrot.slane %v1237_v19, %v2995_v14  ;;  %v1138_v51 = vcombine.high %v1093_v58, %v1125_v24  ;;  %v1139_v7 = vcombine.low %v1100_v20, %v1132_v37 }
 0x22a   :  { %1990 = vrot.lane.b32.xlu1 %v1134_v38, %s2491_s23  ;;  %v1156_v31 = vrot.slane %v1142_v22, %v2982_v39  ;;  %v3111_v55 = vsel %vm804_vm10, %v2781_v46, %v2951_v0  ;;  %v1172_v15 = vrot.slane %v1158_v23, %v2982_v39  ;;  %v864_v16 = vsel %vm804_vm10, %v2901_v42, %v787_v52  ;;  %v686_v57 = vpop.permute.xlu1 %685  ;;  %v721_v18 = vpop.permute.xlu0 %720  ;;  %s2521_s23 = smov 78  }
 0x22b   :  { %1994 = vrot.lane.b32.xlu0 %v1135_v50, %s2492_s24  ;;  %v1206_v12 = vcombine.high %v1149_v47, %v1165_v1  ;;  %v1213_v17 = vrot.slane %v1205_v21, %v2995_v14  ;;  %v840_v45 = vsel %vm804_vm10, %v2829_v61, %v682_v3  ;;  %v832_v46 = vsel %vm804_vm10, %v2805_v53, %v2963_v33  ;;  %v3406_v61 = vld [vmem:[#allocation5_spill] sm:$0xff]  ;;  %s2522_s24 = smov 80  }
 0x22c   :  { %v1253_v0 = vcombine.low %v1188_v11, %v1204_v32  ;;  %v848_v5 = vsel %vm804_vm10, %v2853_v4, %v717_v62  ;;  %v1309_v42 = vcombine.low %v840_v45, %v3104_v40  ;;  %v1252_v56 = vrot.slane %v1238_v35, %v2995_v14  ;;  %v3409_v35 = vld [vmem:[#allocation48_spill] sm:$0xff] }
 0x22d   :  { %v1325_v28 = vcombine.low %v848_v5, %v864_v16  ;;  %v1140_v2 = vcombine.high %v1100_v20, %v1132_v37  ;;  %v1269_v36 = vcombine.low %v1213_v17, %v1245_v10  ;;  %v808_v27 = vsel %vm804_vm10, %v3406_v61, %v2923_v34 }
 0x22e   :  { %1998 = vrot.lane.b32.xlu1 %v1136_v63, %s2493_s25  ;;  %v816_v54 = vsel %vm804_vm10, %v3408_v60, %v3407_v13  ;;  %v1220_v33 = vrot.slane %v1206_v12, %v2995_v14  ;;  %v1221_v53 = vcombine.low %v1156_v31, %v1172_v15  ;;  %v1277_v4 = vcombine.low %v808_v27, %v3111_v55  ;;  %v791_v22 = vpop.permute.xlu0 %790  ;;  %v3414_v12 = vld [vmem:[#allocation35_spill] sm:$0xff]  ;;  %s2523_s25 = smov 82  }
 0x22f   :  { %2002 = vrot.lane.b32.xlu0 %v1137_v44, %s2494_s26  ;;  %v1293_v49 = vcombine.low %v816_v54, %v832_v46  ;;  %v1254_v26 = vcombine.high %v1188_v11, %v1204_v32  ;;  %v1317_v25 = vrot.slane %v1309_v42, %v2982_v39  ;;  %v1261_v3 = vrot.slane %v1253_v0, %v2995_v14  ;;  %v756_v44 = vpop.permute.xlu1 %755  ;;  %s2524_s26 = smov 84  }
 0x230   :  { %v1333_v34 = vrot.slane %v1325_v28, %v2982_v39  ;;  %v1270_v24 = vcombine.high %v1213_v17, %v1245_v10  ;;  %v1271_v30 = vcombine.low %v1220_v33, %v1252_v56  ;;  %v1222_v41 = vcombine.high %v1156_v31, %v1172_v15  ;;  %v3410_v10 = vld [vmem:[#allocation15_spill] sm:$0xff] }
 0x231   :  { %v1229_v62 = vrot.slane %v1221_v53, %v2995_v14  ;;  %v1301_v38 = vrot.slane %v1293_v49, %v2982_v39  ;;  %v1278_v50 = vcombine.high %v808_v27, %v3111_v55  ;;  %v1285_v48 = vrot.slane %v1277_v4, %v2982_v39  ;;  %v3412_v31 = vld [vmem:[#allocation19_spill] sm:$0xff]  ;;  %v3419_v49 = vld [vmem:[#allocation44_spill] sm:$0xff] }
 0x232   :  { %2006 = vrot.lane.b32.xlu1 %v1138_v51, %s2495_s27  ;;  %v1310_v58 = vcombine.high %v840_v45, %v3104_v40  ;;  %v1326_v1 = vcombine.high %v848_v5, %v864_v16  ;;  %v1268_v47 = vrot.slane %v1254_v26, %v2995_v14  ;;  %v1373_v29 = vcombine.low %v1317_v25, %v1333_v34  ;;  %v3413_v15 = vld [vmem:[#allocation31_spill] sm:$0xff]  ;;  %s2525_s27 = smov 86  }
 0x233   :  { %2010 = vrot.lane.b32.xlu0 %v1139_v7, %s2496_s28  ;;  %v1272_v9 = vcombine.high %v1220_v33, %v1252_v56  ;;  %v1273_v37 = vcombine.low %v1229_v62, %v1261_v3  ;;  %v1236_v19 = vrot.slane %v1222_v41, %v2995_v14  ;;  %v1294_v6 = vcombine.high %v816_v54, %v832_v46  ;;  %v3411_v7 = vld [vmem:[#allocation52_spill] sm:$0xff]  ;;  %v3415_v56 = vld [vmem:[#allocation23_spill] sm:$0xff]  ;;  %v3418_v33 = vld [vmem:[#allocation6_spill] sm:$0xff]  ;;  %s2526_s28 = smov 88  }
 0x234   :  { %v1341_v63 = vcombine.low %v1285_v48, %v1301_v38  ;;  %v1324_v23 = vrot.slane %v1310_v58, %v2982_v39  ;;  %v1340_v20 = vrot.slane %v1326_v1, %v2982_v39  ;;  %v1374_v21 = vcombine.high %v1317_v25, %v1333_v34  ;;  %v3417_v54 = vld [vmem:[#allocation39_spill] sm:$0xff] }
 0x235   :  { %v1292_v52 = vrot.slane %v1278_v50, %v2982_v39  ;;  %v1381_v11 = vrot.slane %v1373_v29, %v2995_v14  ;;  %v1274_v32 = vcombine.high %v1229_v62, %v1261_v3  ;;  %v1275_v40 = vcombine.low %v1236_v19, %v1268_v47  ;;  %v3420_v4 = vld [vmem:[#allocation11_spill] sm:$0xff]  ;;  %v690_v62 = vpop.permute.xlu1 %689 }
 0x236   :  { %2014 = vrot.lane.b32.xlu1 %v1140_v2, %s2497_s29  ;;  %v3151_v51 = vsel %vm804_vm10, %v3410_v10, %v3409_v35  ;;  %v3156_v55 = vsel %vm804_vm10, %v3412_v31, %v3411_v7  ;;  %v857_v16 = vsel %vm804_vm10, %v3413_v15, %v756_v44  ;;  %v865_v17 = vsel %vm804_vm10, %v3414_v12, %v791_v22  ;;  %v3416_v2 = vld [vmem:[#allocation27_spill] sm:$0xff]  ;;  %v3421_v10 = vld [vmem:[#allocation49_spill] sm:$0xff]  ;;  %v3422_v7 = vld [vmem:[#allocation16_spill] sm:$0xff]  ;;  %s2527_s29 = smov 90  }
 0x237   :  { %2018 = vrot.lane.b32.xlu0 %v1269_v36, %s2498_s30  ;;  %v1308_v45 = vrot.slane %v1294_v6, %v2982_v39  ;;  %v1342_v46 = vcombine.high %v1285_v48, %v1301_v38  ;;  %v1349_v0 = vrot.slane %v1341_v63, %v2995_v14  ;;  %v1388_v5 = vrot.slane %v1374_v21, %v2995_v14  ;;  %v725_v38 = vpop.permute.xlu0 %724  ;;  %v3423_v12 = vld [vmem:[#allocation53_spill] sm:$0xff]  ;;  %s2528_s30 = smov 92  }
 0x238   :  { %v1389_v42 = vcombine.low %v1324_v23, %v1340_v20  ;;  %v841_v28 = vsel %vm804_vm10, %v3415_v56, %v686_v57  ;;  %v849_v36 = vsel %vm804_vm10, %v3416_v2, %v721_v18  ;;  %v1276_v13 = vcombine.high %v1236_v19, %v1268_v47 }
 0x239   :  { %v1445_v61 = vcombine.low %v841_v28, %v857_v16  ;;  %v1461_v27 = vcombine.low %v849_v36, %v865_v17  ;;  %v1405_v60 = vcombine.low %v1349_v0, %v1381_v11  ;;  %v809_v53 = vsel %vm804_vm10, %v3418_v33, %v3417_v54 }
 0x23a   :  { %2022 = vrot.lane.b32.xlu1 %v1270_v24, %s2499_s4  ;;  %v817_v26 = vsel %vm804_vm10, %v3420_v4, %v3419_v49  ;;  %v1356_v25 = vrot.slane %v1342_v46, %v2995_v14  ;;  %v1357_v3 = vcombine.low %v1292_v52, %v1308_v45  ;;  %v1413_v57 = vcombine.low %v809_v53, %v3151_v51  ;;  %v3425_v46 = vld [vmem:[#allocation32_spill] sm:$0xff]  ;;  %s2529_s4 = smov 94  }
 0x23b   :  { %2026 = vrot.lane.b32.xlu0 %v1271_v30, %s2500_s5  ;;  %v1429_v34 = vcombine.low %v817_v26, %v3156_v55  ;;  %v1390_v18 = vcombine.high %v1324_v23, %v1340_v20  ;;  %v1397_v24 = vrot.slane %v1389_v42, %v2995_v14  ;;  %v1453_v30 = vrot.slane %v1445_v61, %v2982_v39  ;;  %s2530_s5 = smov 96  }
 0x23c   :  { %v1469_v41 = vrot.slane %v1461_v27, %v2982_v39  ;;  %v1406_v50 = vcombine.high %v1349_v0, %v1381_v11  ;;  %v1407_v48 = vcombine.low %v1356_v25, %v1388_v5  ;;  %v1358_v58 = vcombine.high %v1292_v52, %v1308_v45  ;;  %v760_v52 = vpop.permute.xlu1 %759  ;;  %v795_v11 = vpop.permute.xlu0 %794  ;;  %v3427_v27 = vld [vmem:[#allocation24_spill] sm:$0xff] }
 0x23d   :  { %v1365_v1 = vrot.slane %v1357_v3, %v2995_v14  ;;  %v1437_v47 = vrot.slane %v1429_v34, %v2982_v39  ;;  %v1421_v29 = vrot.slane %v1413_v57, %v2982_v39  ;;  %v1404_v19 = vrot.slane %v1390_v18, %v2995_v14  ;;  %v3431_v34 = vld [vmem:[#allocation45_spill] sm:$0xff]  ;;  %v3432_v57 = vld [vmem:[#allocation12_spill] sm:$0xff] }
 0x23e   :  { %2030 = vrot.lane.b32.xlu1 %v1272_v9, %s2501_s6  ;;  %v1446_v9 = vcombine.high %v841_v28, %v857_v16  ;;  %v1509_v6 = vcombine.low %v1453_v30, %v1469_v41  ;;  %v1408_v63 = vcombine.high %v1356_v25, %v1388_v5  ;;  %v1414_v22 = vcombine.high %v809_v53, %v3151_v51  ;;  %v3426_v5 = vld [vmem:[#allocation36_spill] sm:$0xff]  ;;  %v3430_v25 = vld [vmem:[#allocation7_spill] sm:$0xff]  ;;  %s2531_s6 = smov 98  }
 0x23f   :  { %2034 = vrot.lane.b32.xlu0 %v1273_v37, %s2502_s7  ;;  %v1462_v37 = vcombine.high %v849_v36, %v865_v17  ;;  %v1409_v44 = vcombine.low %v1365_v1, %v1397_v24  ;;  %v1372_v23 = vrot.slane %v1358_v58, %v2995_v14  ;;  %v1430_v20 = vcombine.high %v817_v26, %v3156_v55  ;;  %v3424_v17 = vld [vmem:[#allocation20_spill] sm:$0xff]  ;;  %s2532_s7 = smov 100  }
 0x240   :  { %v1477_v21 = vcombine.low %v1421_v29, %v1437_v47  ;;  %v1510_v35 = vcombine.high %v1453_v30, %v1469_v41  ;;  %v3193_v51 = vsel %vm804_vm10, %v3422_v7, %v3421_v10  ;;  %v1517_v31 = vrot.slane %v1509_v6, %v2995_v14  ;;  %v3429_v26 = vld [vmem:[#allocation40_spill] sm:$0xff] }
 0x241   :  { %v1410_v55 = vcombine.high %v1365_v1, %v1397_v24  ;;  %v1411_v15 = vcombine.low %v1372_v23, %v1404_v19  ;;  %v1428_v16 = vrot.slane %v1414_v22, %v2982_v39  ;;  %v3200_v45 = vsel %vm804_vm10, %v3424_v17, %v3423_v12  ;;  %v694_v1 = vpop.permute.xlu1 %693 }
 0x242   :  { %2038 = vrot.lane.b32.xlu1 %v1274_v32, %s2503_s8  ;;  %v1460_v32 = vrot.slane %v1446_v9, %v2982_v39  ;;  %v858_v0 = vsel %vm804_vm10, %v3425_v46, %v760_v52  ;;  %v866_v42 = vsel %vm804_vm10, %v3426_v5, %v795_v11  ;;  %v1444_v56 = vrot.slane %v1430_v20, %v2982_v39  ;;  %v3434_v46 = vld [vmem:[#allocation17_spill] sm:$0xff]  ;;  %s2533_s8 = smov 102  }
 0x243   :  { %2042 = vrot.lane.b32.xlu0 %v1275_v40, %s2504_s9  ;;  %v1476_v40 = vrot.slane %v1462_v37, %v2982_v39  ;;  %v1478_v28 = vcombine.high %v1421_v29, %v1437_v47  ;;  %v1485_v2 = vrot.slane %v1477_v21, %v2995_v14  ;;  %v1524_v36 = vrot.slane %v1510_v35, %v2995_v14  ;;  %v729_v47 = vpop.permute.xlu0 %728  ;;  %s2534_s9 = smov 104  }
 0x244   :  { %v1412_v49 = vcombine.high %v1372_v23, %v1404_v19  ;;  %v810_v3 = vsel %vm804_vm10, %v3430_v25, %v3429_v26  ;;  %v818_v18 = vsel %vm804_vm10, %v3432_v57, %v3431_v34  ;;  %v1493_v30 = vcombine.low %v1428_v16, %v1444_v56 }
 0x245   :  { %v1525_v61 = vcombine.low %v1460_v32, %v1476_v40  ;;  %v1541_v4 = vcombine.low %v1485_v2, %v1517_v31  ;;  %v1492_v24 = vrot.slane %v1478_v28, %v2995_v14  ;;  %v1565_v41 = vcombine.low %v818_v18, %v3200_v45  ;;  %v764_v10 = vpop.permute.xlu1 %763  ;;  %v3436_v28 = vld [vmem:[#allocation37_spill] sm:$0xff] }
 0x246   :  { %2046 = vrot.lane.b32.xlu1 %v1276_v13, %s2505_s10  ;;  %v842_v13 = vsel %vm804_vm10, %v3427_v27, %v690_v62  ;;  %v1549_v62 = vcombine.low %v810_v3, %v3193_v51  ;;  %v1542_v29 = vcombine.high %v1485_v2, %v1517_v31  ;;  %v1494_v37 = vcombine.high %v1428_v16, %v1444_v56  ;;  %v3437_v27 = vld [vmem:[#allocation54_spill] sm:$0xff]  ;;  %s2535_s10 = smov 106  }
 0x247   :  { %2050 = vrot.lane.b32.xlu0 %v1405_v60, %s2506_s11  ;;  %v3428_v60 = vld [vmem:[#allocation28_spill] sm:$0xff]  ;;  %v1581_v33 = vcombine.low %v842_v13, %v858_v0  ;;  %v1543_v9 = vcombine.low %v1492_v24, %v1524_v36  ;;  %v1501_v19 = vrot.slane %v1493_v30, %v2995_v14  ;;  %v1573_v6 = vrot.slane %v1565_v41, %v2982_v39  ;;  %v799_v7 = vpop.permute.xlu0 %798  ;;  %v3443_v41 = vld [vmem:[#allocation46_spill] sm:$0xff]  ;;  %s2536_s11 = smov 108  }
 0x248   :  { %v850_v54 = vsel %vm804_vm10, %v3428_v60, %v725_v38  ;;  %v1526_v38 = vcombine.high %v1460_v32, %v1476_v40  ;;  %v1582_v22 = vcombine.high %v842_v13, %v858_v0  ;;  %v1544_v52 = vcombine.high %v1492_v24, %v1524_v36  ;;  %v3438_v13 = vld [vmem:[#allocation21_spill] sm:$0xff]  ;;  %v3442_v24 = vld [vmem:[#allocation8_spill] sm:$0xff] }
 0x249   :  { %v1597_v53 = vcombine.low %v850_v54, %v866_v42  ;;  %v1598_v23 = vcombine.high %v850_v54, %v866_v42  ;;  %v1566_v32 = vcombine.high %v818_v18, %v3200_v45  ;;  %v1508_v40 = vrot.slane %v1494_v37, %v2995_v14  ;;  %v3433_v45 = vld [vmem:[#allocation50_spill] sm:$0xff]  ;;  %v3435_v42 = vld [vmem:[#allocation33_spill] sm:$0xff] }
 0x24a   :  { %2054 = vrot.lane.b32.xlu1 %v1406_v50, %s2507_s12  ;;  %v1533_v50 = vrot.slane %v1525_v61, %v2995_v14  ;;  %v1540_v20 = vrot.slane %v1526_v38, %v2995_v14  ;;  %v3239_v0 = vsel %vm804_vm10, %v3434_v46, %v3433_v45  ;;  %v859_v56 = vsel %vm804_vm10, %v3435_v42, %v764_v10  ;;  %v3441_v18 = vld [vmem:[#allocation41_spill] sm:$0xff]  ;;  %v3445_v46 = vld [vmem:[#allocation51_spill] sm:$0xff]  ;;  %s2537_s12 = smov 110  }
 0x24b   :  { %2058 = vrot.lane.b32.xlu0 %v1407_v48, %s2508_s13  ;;  %v1589_v48 = vrot.slane %v1581_v33, %v2982_v39  ;;  %v1605_v58 = vrot.slane %v1597_v53, %v2982_v39  ;;  %v1612_v31 = vrot.slane %v1598_v23, %v2982_v39  ;;  %v1580_v5 = vrot.slane %v1566_v32, %v2982_v39  ;;  %v3439_v53 = vld [vmem:[#allocation25_spill] sm:$0xff]  ;;  %s2538_s13 = smov 112  }
 0x24c   :  { %v1545_v11 = vcombine.low %v1501_v19, %v1533_v50  ;;  %v1546_v12 = vcombine.high %v1501_v19, %v1533_v50  ;;  %v1547_v17 = vcombine.low %v1508_v40, %v1540_v20  ;;  %v867_v2 = vsel %vm804_vm10, %v3436_v28, %v799_v7  ;;  %v698_v19 = vpop.permute.xlu1 %697 }
 0x24d   :  { %v1645_v21 = vcombine.low %v1589_v48, %v1605_v58  ;;  %v3250_v60 = vsel %vm804_vm10, %v3438_v13, %v3437_v27  ;;  %v1548_v34 = vcombine.high %v1508_v40, %v1540_v20  ;;  %v811_v30 = vsel %vm804_vm10, %v3442_v24, %v3441_v18  ;;  %v3449_v13 = vld [vmem:[#allocation34_spill] sm:$0xff] }
 0x24e   :  { %2062 = vrot.lane.b32.xlu1 %v1408_v63, %s2509_s14  ;;  %v1550_v63 = vcombine.high %v810_v3, %v3193_v51  ;;  %v1596_v51 = vrot.slane %v1582_v22, %v2982_v39  ;;  %v1686_v7 = vcombine.high %v811_v30, %v3239_v0  ;;  %s2539_s14 = smov 114  }
 0x24f   :  { %2066 = vrot.lane.b32.xlu0 %v1409_v44, %s2510_s15  ;;  %v1557_v44 = vrot.slane %v1549_v62, %v2982_v39  ;;  %v1653_v16 = vrot.slane %v1645_v21, %v2995_v14  ;;  %v3444_v62 = vld [vmem:[#allocation13_spill] sm:$0xff]  ;;  %s2540_s15 = smov 116  }
 0x250   :  { %v1661_v33 = vcombine.low %v1596_v51, %v1612_v31  ;;  %v819_v38 = vsel %vm804_vm10, %v3444_v62, %v3443_v41 }
 0x251   :  { %v1613_v35 = vcombine.low %v1557_v44, %v1573_v6  ;;  %v1614_v36 = vcombine.high %v1557_v44, %v1573_v6  ;;  %v733_v6 = vpop.permute.xlu0 %732 }
 0x252   :  { %2070 = vrot.lane.b32.xlu1 %v1410_v55, %s2511_s16  ;;  %v1646_v55 = vcombine.high %v1589_v48, %v1605_v58  ;;  %v1701_v58 = vcombine.low %v819_v38, %v3250_v60  ;;  %s2541_s16 = smov 118  }
 0x253   :  { %2074 = vrot.lane.b32.xlu0 %v1411_v15, %s2512_s17  ;;  %v1564_v15 = vrot.slane %v1550_v63, %v2982_v39  ;;  %v1621_v61 = vrot.slane %v1613_v35, %v2995_v14  ;;  %v1628_v50 = vrot.slane %v1614_v36, %v2995_v14  ;;  %v3447_v36 = vld [vmem:[#allocation55_spill] sm:$0xff]  ;;  %s2542_s17 = smov 120  }
 0x254   :  { %v1660_v54 = vrot.slane %v1646_v55, %v2995_v14  ;;  %v1709_v20 = vrot.slane %v1701_v58, %v2982_v39  ;;  %v3455_v58 = vld [vmem:[#allocation47_spill] sm:$0xff] }
 0x255   :  { %v1677_v57 = vcombine.low %v1621_v61, %v1653_v16  ;;  %v1629_v48 = vcombine.low %v1564_v15, %v1580_v5  ;;  %v1678_v63 = vcombine.high %v1621_v61, %v1653_v16  ;;  %v1630_v22 = vcombine.high %v1564_v15, %v1580_v5  ;;  %v768_v15 = vpop.permute.xlu1 %767  ;;  %v803_v16 = vpop.permute.xlu0 %802  ;;  %v3446_v5 = vld [vmem:[#allocation18_spill] sm:$0xff] }
 0x256   :  { %2078 = vrot.lane.b32.xlu1 %v1412_v49, %s2513_s0  ;;  %v843_v49 = vsel %vm804_vm10, %v3439_v53, %v694_v1  ;;  %v1685_v1 = vcombine.low %v811_v30, %v3239_v0  ;;  %v1679_v44 = vcombine.low %v1628_v50, %v1660_v54  ;;  %v1680_v35 = vcombine.high %v1628_v50, %v1660_v54  ;;  %v3448_v61 = vld [vmem:[#allocation22_spill] sm:$0xff]  ;;  %v3454_v50 = vld [vmem:[#allocation9_spill] sm:$0xff]  ;;  %s2543_s0 = smov 122  }
 0x257   :  { %2082 = vrot.lane.b32.xlu0 %v1541_v4, %s2514_s1  ;;  %v3440_v4 = vld [vmem:[#allocation29_spill] sm:$0xff]  ;;  %v1717_v25 = vcombine.low %v843_v49, %v859_v56  ;;  %v1637_v23 = vrot.slane %v1629_v48, %v2995_v14  ;;  %v3281_v0 = vsel %vm804_vm10, %v3446_v5, %v3445_v46  ;;  %v3288_v27 = vsel %vm804_vm10, %v3448_v61, %v3447_v36  ;;  %v3450_v54 = vld [vmem:[#allocation38_spill] sm:$0xff]  ;;  %s2544_s1 = smov 124  }
 0x258   :  { %v851_v26 = vsel %vm804_vm10, %v3440_v4, %v729_v47  ;;  %v1662_v47 = vcombine.high %v1596_v51, %v1612_v31  ;;  %v1693_v21 = vrot.slane %v1685_v1, %v2982_v39  ;;  %v1644_v51 = vrot.slane %v1630_v22, %v2995_v14  ;;  %v3456_v1 = vld [vmem:[#allocation14_spill] sm:$0xff] }
 0x259   :  { %v1733_v3 = vcombine.low %v851_v26, %v867_v2  ;;  %v1702_v31 = vcombine.high %v819_v38, %v3250_v60  ;;  %v860_v60 = vsel %vm804_vm10, %v3449_v13, %v768_v15  ;;  %v3453_v38 = vld [vmem:[#allocation42_spill] sm:$0xff] }
 0x25a   :  { %2086 = vrot.lane.b32.xlu1 %v1542_v29, %s2515_s2  ;;  %v1669_v29 = vrot.slane %v1661_v33, %v2995_v14  ;;  %v1676_v32 = vrot.slane %v1662_v47, %v2995_v14  ;;  %v1749_v55 = vcombine.low %v1693_v21, %v1709_v20  ;;  %v868_v33 = vsel %vm804_vm10, %v3450_v54, %v803_v16  ;;  %s2545_s2 = smov 126  }
 0x25b   :  { %2090 = vrot.lane.b32.xlu0 %v1543_v9, %s2516_s18  ;;  %v1725_v9 = vrot.slane %v1717_v25, %v2982_v39  ;;  %v1741_v37 = vrot.slane %v1733_v3, %v2982_v39  ;;  %v1716_v53 = vrot.slane %v1702_v31, %v2982_v39  ;;  %v3451_v3 = vld [vmem:[#allocation26_spill] sm:$0xff]  ;;  %v812_v48 = vsel %vm804_vm10, %v3454_v50, %v3453_v38  ;;  %s2546_s18 = smov [#allocation2]  }
 0x25c   :  { %v1681_v10 = vcombine.low %v1637_v23, %v1669_v29  ;;  %v1683_v28 = vcombine.low %v1644_v51, %v1676_v32  ;;  %v1757_v4 = vrot.slane %v1749_v55, %v2995_v14  ;;  %v1684_v41 = vcombine.high %v1644_v51, %v1676_v32 }
 0x25d   :  { %v1781_v40 = vcombine.low %v1725_v9, %v1741_v37  ;;  %v1782_v45 = vcombine.high %v1725_v9, %v1741_v37  ;;  %v820_v47 = vsel %vm804_vm10, %v3456_v1, %v3455_v58 }
 0x25e   :  { %2094 = vrot.lane.b32.xlu1 %v1544_v52, %s2517_s19  ;;  %v1718_v52 = vcombine.high %v843_v49, %v859_v56  ;;  %v1682_v56 = vcombine.high %v1637_v23, %v1669_v29  ;;  %v1750_v49 = vcombine.high %v1693_v21, %v1709_v20  ;;  %v1837_v37 = vcombine.low %v820_v47, %v3288_v27  ;;  %s2342_s19 = sshll.u32 %s2546_s18, 4  ;;  %s2343_s19 = int_to_ptr.vmem [resolvable:$true] %s2342_s19 }
 0x25f   :  { %2098 = vrot.lane.b32.xlu0 %v1545_v11, %s2518_s20  ;;  %v1734_v11 = vcombine.high %v851_v26, %v867_v2  ;;  %v1789_v42 = vrot.slane %v1781_v40, %v2995_v14  ;;  %v1700_v2 = vrot.slane %v1686_v7, %v2982_v39  ;;  %v1796_v26 = vrot.slane %v1782_v45, %v2995_v14  ;;  %s2450_s20 = scalar_lea.vmem %s2343_s19, 128  ;;  %p2455_p1 = scmp.lt.s32.totalorder %s2343_s19, %s2343_s19 }
 0x260   :  { %v1764_v29 = vrot.slane %v1750_v49, %v2995_v14  ;;  %v1838_v15 = vcombine.high %v820_v47, %v3288_v27  ;;  %p2451_p0 = scmp.ne.s32.totalorder %s2343_s19, %s2450_s20  ;;  %p2456_p2 = scmp.lt.s32.totalorder %s2450_s20, %s2450_s20 }
 0x261   :  { %v1813_v62 = vcombine.low %v1757_v4, %v1789_v42  ;;  %v1765_v9 = vcombine.low %v1700_v2, %v1716_v53  ;;  %v1814_v23 = vcombine.high %v1757_v4, %v1789_v42  ;;  %v1766_v21 = vcombine.high %v1700_v2, %v1716_v53 }
 0x262   :  { %2102 = vrot.lane.b32.xlu1 %v1546_v12, %s2519_s21  ;;  %v1732_v12 = vrot.slane %v1718_v52, %v2982_v39  ;;  %v1815_v20 = vcombine.low %v1764_v29, %v1796_v26  ;;  %v1816_v51 = vcombine.high %v1764_v29, %v1796_v26  ;;  %p2457_p3 = por %p2456_p2, %p2455_p1 }
 0x263   :  { %2106 = vrot.lane.b32.xlu0 %v1547_v17, %s2520_s22  ;;  %v1748_v17 = vrot.slane %v1734_v11, %v2982_v39  ;;  %v1773_v52 = vrot.slane %v1765_v9, %v2995_v14  ;;  %v1845_v11 = vrot.slane %v1837_v37, %v2982_v39  ;;  %v1780_v55 = vrot.slane %v1766_v21, %v2995_v14 }
 0x264   :  { %p2458_p4 = pnand %p2457_p3, %p2451_p0 }
 0x265   :  { %v1797_v25 = vcombine.low %v1732_v12, %v1748_v17 }
 0x266   :  { %2110 = vrot.lane.b32.xlu1 %v1548_v34, %s2521_s23  ;;  %v844_v34 = vsel %vm804_vm10, %v3451_v3, %v698_v19  ;;  %v1821_v19 = vcombine.low %v812_v48, %v3281_v0 }
 0x267   :  { %2114 = vrot.lane.b32.xlu0 %v1677_v57, %s2522_s24  ;;  %v3452_v57 = vld [vmem:[#allocation30_spill] sm:$0xff]  ;;  %v1853_v24 = vcombine.low %v844_v34, %v860_v60  ;;  %v1854_v40 = vcombine.high %v844_v34, %v860_v60 }
 0x268   :  { %v852_v18 = vsel %vm804_vm10, %v3452_v57, %v733_v6  ;;  %v1798_v6 = vcombine.high %v1732_v12, %v1748_v17  ;;  %v1829_v32 = vrot.slane %v1821_v19, %v2982_v39  ;;  %v1822_v12 = vcombine.high %v812_v48, %v3281_v0 }
 0x269   :  { %v1869_v30 = vcombine.low %v852_v18, %v868_v33  ;;  %v1868_v17 = vrot.slane %v1854_v40, %v2982_v39  ;;  %vm2239_vm10 = vcmask 261120  }
 0x26a   :  { %2118 = vrot.lane.b32.xlu1 %v1678_v63, %s2523_s25  ;;  %v1805_v63 = vrot.slane %v1797_v25, %v2995_v14  ;;  %v1885_v16 = vcombine.low %v1829_v32, %v1845_v11  ;;  %v1886_v2 = vcombine.high %v1829_v32, %v1845_v11  ;;  %v1836_v0 = vrot.slane %v1822_v12, %v2982_v39 }
 0x26b   :  { %2122 = vrot.lane.b32.xlu0 %v1679_v44, %s2524_s26  ;;  %v1861_v44 = vrot.slane %v1853_v24, %v2982_v39  ;;  %v1877_v22 = vrot.slane %v1869_v30, %v2982_v39 }
 0x26c   :  { %v1817_v31 = vcombine.low %v1773_v52, %v1805_v63  ;;  %v1818_v42 = vcombine.high %v1773_v52, %v1805_v63  ;;  %v1893_v36 = vrot.slane %v1885_v16, %v2995_v14  ;;  %v1900_v54 = vrot.slane %v1886_v2, %v2995_v14 }
 0x26d   :  { %v1917_v7 = vcombine.low %v1861_v44, %v1877_v22  ;;  %v1918_v46 = vcombine.high %v1861_v44, %v1877_v22 }
 0x26e   :  { %2126 = vrot.lane.b32.xlu1 %v1680_v35, %s2525_s27  ;;  %v1870_v35 = vcombine.high %v852_v18, %v868_v33 }
 0x26f   :  { %2130 = vrot.lane.b32.xlu0 %v1681_v10, %s2526_s28  ;;  %v1812_v10 = vrot.slane %v1798_v6, %v2995_v14  ;;  %v1925_v5 = vrot.slane %v1917_v7, %v2995_v14  ;;  %v1932_v61 = vrot.slane %v1918_v46, %v2995_v14 }
 0x270   :  { %v1884_v45 = vrot.slane %v1870_v35, %v2982_v39 }
 0x271   :  { %v1820_v13 = vcombine.high %v1780_v55, %v1812_v10  ;;  %v1949_v60 = vcombine.low %v1893_v36, %v1925_v5  ;;  %v1950_v4 = vcombine.high %v1893_v36, %v1925_v5  ;;  %v1951_v26 = vcombine.low %v1900_v54, %v1932_v61 }
 0x272   :  { %2134 = vrot.lane.b32.xlu1 %v1682_v56, %s2527_s29  ;;  %v1819_v56 = vcombine.low %v1780_v55, %v1812_v10  ;;  %v1933_v27 = vcombine.low %v1868_v17, %v1884_v45  ;;  %v1934_v53 = vcombine.high %v1868_v17, %v1884_v45  ;;  %v1952_v18 = vcombine.high %v1900_v54, %v1932_v61 }
 0x273   :  { %2138 = vrot.lane.b32.xlu0 %v1683_v28, %s2528_s30  ;;  %v1852_v28 = vrot.slane %v1838_v15, %v2982_v39 }
 0x274   :  { %v1941_v49 = vrot.slane %v1933_v27, %v2995_v14  ;;  %v1948_v3 = vrot.slane %v1934_v53, %v2995_v14 }
 0x275   :  { %v1901_v33 = vcombine.low %v1836_v0, %v1852_v28  ;;  %v1902_v25 = vcombine.high %v1836_v0, %v1852_v28 }
 0x276   :  { %2142 = vrot.lane.b32.xlu1 %v1684_v41, %s2529_s4 }
 0x277   :  { %2146 = vrot.lane.b32.xlu0 %v1813_v62, %s2530_s5  ;;  %v1909_v39 = vrot.slane %v1901_v33, %v2995_v14  ;;  %v1916_v41 = vrot.slane %v1902_v25, %v2995_v14 }
 0x279   :  { %v1953_v24 = vcombine.low %v1909_v39, %v1941_v49  ;;  %v1954_v48 = vcombine.high %v1909_v39, %v1941_v49  ;;  %v1955_v58 = vcombine.low %v1916_v41, %v1948_v3 }
 0x27a   :  { %2150 = vrot.lane.b32.xlu1 %v1814_v23, %s2531_s6 }
 0x27b   :  { %2154 = vrot.lane.b32.xlu0 %v1815_v20, %s2532_s7 }
 0x27e   :  { %2158 = vrot.lane.b32.xlu1 %v1816_v51, %s2533_s8 }
 0x27f   :  { %2162 = vrot.lane.b32.xlu0 %v1817_v31, %s2534_s9 }
 0x282   :  { %2166 = vrot.lane.b32.xlu1 %v1818_v42, %s2535_s10 }
 0x283   :  { %2170 = vrot.lane.b32.xlu0 %v1819_v56, %s2536_s11 }
 0x286   :  { %2174 = vrot.lane.b32.xlu1 %v1820_v13, %s2537_s12 }
 0x287   :  { %2178 = vrot.lane.b32.xlu0 %v1949_v60, %s2538_s13 }
 0x28a   :  { %2182 = vrot.lane.b32.xlu1 %v1950_v4, %s2539_s14 }
 0x28b   :  { %2186 = vrot.lane.b32.xlu0 %v1951_v26, %s2540_s15 }
 0x28c   :  { %v1959_v34 = vpop.permute.xlu1 %1958 }
 0x28d   :  { %v1963_v57 = vpop.permute.xlu0 %1962  ;;  %v2210_v30 = vsel %vm2209_vm11, %v997_v43, %v1959_v34  ;;  %v1956_v43 = vcombine.high %v1916_v41, %v1948_v3  ;;  %vm2241_vm11 = vcmask 277504  }
 0x28e   :  { %2190 = vrot.lane.b32.xlu1 %v1952_v18, %s2541_s16  ;;  %v2212_v62 = vsel %vm2211_vm12, %v2210_v30, %v1963_v57  ;;  %vm2243_vm12 = vcmask 293888  }
 0x28f   :  { %2194 = vrot.lane.b32.xlu0 %v1953_v24, %s2542_s17 }
 0x290   :  { %v1967_v38 = vpop.permute.xlu1 %1966 }
 0x291   :  { %v1971_v50 = vpop.permute.xlu0 %1970  ;;  %v2214_v1 = vsel %vm2213_vm13, %v2212_v62, %v1967_v38  ;;  %vm2245_vm13 = vcmask 310272  }
 0x292   :  { %2198 = vrot.lane.b32.xlu1 %v1954_v48, %s2543_s0  ;;  %v2216_v59 = vsel %vm2215_vm14, %v2214_v1, %v1971_v50  ;;  %vm2247_vm14 = vcmask 326656  }
 0x293   :  { %2202 = vrot.lane.b32.xlu0 %v1955_v58, %s2544_s1 }
 0x294   :  { %v1975_v8 = vpop.permute.xlu1 %1974 }
 0x295   :  { %v1979_v14 = vpop.permute.xlu0 %1978  ;;  %v2218_v47 = vsel %vm2217_vm15, %v2216_v59, %v1975_v8  ;;  %vm2249_vm15 = vcmask 343040  }
 0x296   :  { %2206 = vrot.lane.b32.xlu1 %v1956_v43, %s2545_s2  ;;  %v2220_v29 = vsel %vm2219_vm0, %v2218_v47, %v1979_v14  ;;  %vm2251_vm0 = vcmask 359424  }
 0x298   :  { %v1983_v9 = vpop.permute.xlu1 %1982 }
 0x299   :  { %v1987_v37 = vpop.permute.xlu0 %1986  ;;  %v2222_v19 = vsel %vm2221_vm1, %v2220_v29, %v1983_v9  ;;  %vm2253_vm1 = vcmask 375808  }
 0x29a   :  { %v2224_v6 = vsel %vm2223_vm2, %v2222_v19, %v1987_v37  ;;  %vm2255_vm2 = vcmask 392192  }
 0x29c   :  { %v1991_v63 = vpop.permute.xlu1 %1990 }
 0x29d   :  { %v1995_v44 = vpop.permute.xlu0 %1994  ;;  %v2226_v22 = vsel %vm2225_vm3, %v2224_v6, %v1991_v63  ;;  %vm2257_vm3 = vcmask 408576  }
 0x29e   :  { %v2228_v23 = vsel %vm2227_vm4, %v2226_v22, %v1995_v44  ;;  %vm2259_vm4 = vcmask 424960  }
 0x2a0   :  { %v1999_v20 = vpop.permute.xlu1 %1998 }
 0x2a1   :  { %v2003_v21 = vpop.permute.xlu0 %2002  ;;  %v2230_v52 = vsel %vm2229_vm5, %v2228_v23, %v1999_v20  ;;  %vm2261_vm5 = vcmask 441344  }
 0x2a2   :  { %v2232_v11 = vsel %vm2231_vm6, %v2230_v52, %v2003_v21  ;;  %vm2263_vm6 = vcmask 457728  }
 0x2a4   :  { %v2007_v32 = vpop.permute.xlu1 %2006 }
 0x2a5   :  { %v2011_v40 = vpop.permute.xlu0 %2010  ;;  %v2234_v35 = vsel %vm2233_vm7, %v2232_v11, %v2007_v32  ;;  %vm2265_vm7 = vcmask 474112  }
 0x2a6   :  { %v2236_v10 = vsel %vm2235_vm8, %v2234_v35, %v2011_v40  ;;  %vm2267_vm8 = vcmask 490496  }
 0x2a8   :  { %v2015_v7 = vpop.permute.xlu1 %2014 }
 0x2a9   :  { %v2019_v51 = vpop.permute.xlu0 %2018  ;;  %v2238_v31 = vsel %vm2237_vm9, %v2236_v10, %v2015_v7  ;;  %vm2269_vm9 = vcmask 506880  }
 0x2aa   :  { %v2240_v55 = vsel %vm2239_vm10, %v2238_v31, %v2019_v51  ;;  %vm2271_vm10 = vcmask 523264  }
 0x2ac   :  { %v2023_v15 = vpop.permute.xlu1 %2022 }
 0x2ad   :  { %v2027_v16 = vpop.permute.xlu0 %2026  ;;  %v2242_v12 = vsel %vm2241_vm11, %v2240_v55, %v2023_v15  ;;  %vm2273_vm11 = vcmask 539648  }
 0x2ae   :  { %v2244_v17 = vsel %vm2243_vm12, %v2242_v12, %v2027_v16  ;;  %vm2275_vm12 = vcmask 556032  }
 0x2b0   :  { %v2031_v45 = vpop.permute.xlu1 %2030 }
 0x2b1   :  { %v2035_v46 = vpop.permute.xlu0 %2034  ;;  %v2246_v5 = vsel %vm2245_vm13, %v2244_v17, %v2031_v45  ;;  %vm2277_vm13 = vcmask 572416  }
 0x2b2   :  { %v2248_v42 = vsel %vm2247_vm14, %v2246_v5, %v2035_v46  ;;  %vm2279_vm14 = vcmask 588800  }
 0x2b4   :  { %v2039_v56 = vpop.permute.xlu1 %2038 }
 0x2b5   :  { %v2043_v28 = vpop.permute.xlu0 %2042  ;;  %v2250_v2 = vsel %vm2249_vm15, %v2248_v42, %v2039_v56  ;;  %vm2281_vm15 = vcmask 605184  }
 0x2b6   :  { %v2252_v36 = vsel %vm2251_vm0, %v2250_v2, %v2043_v28  ;;  %vm2283_vm0 = vcmask 621568  }
 0x2b8   :  { %v2047_v0 = vpop.permute.xlu1 %2046 }
 0x2b9   :  { %v2051_v61 = vpop.permute.xlu0 %2050  ;;  %v2254_v27 = vsel %vm2253_vm1, %v2252_v36, %v2047_v0  ;;  %vm2285_vm1 = vcmask 637952  }
 0x2ba   :  { %v2256_v13 = vsel %vm2255_vm2, %v2254_v27, %v2051_v61  ;;  %vm2287_vm2 = vcmask 654336  }
 0x2bc   :  { %v2055_v60 = vpop.permute.xlu1 %2054 }
 0x2bd   :  { %v2059_v54 = vpop.permute.xlu0 %2058  ;;  %v2258_v33 = vsel %vm2257_vm3, %v2256_v13, %v2055_v60  ;;  %vm2289_vm3 = vcmask 670720  }
 0x2be   :  { %v2260_v53 = vsel %vm2259_vm4, %v2258_v33, %v2059_v54  ;;  %vm2291_vm4 = vcmask 687104  }
 0x2c0   :  { %v2063_v49 = vpop.permute.xlu1 %2062 }
 0x2c1   :  { %v2067_v4 = vpop.permute.xlu0 %2066  ;;  %v2262_v26 = vsel %vm2261_vm5, %v2260_v53, %v2063_v49  ;;  %vm2293_vm5 = vcmask 703488  }
 0x2c2   :  { %v2264_v25 = vsel %vm2263_vm6, %v2262_v26, %v2067_v4  ;;  %vm2295_vm6 = vcmask 719872  }
 0x2c4   :  { %v2071_v39 = vpop.permute.xlu1 %2070 }
 0x2c5   :  { %v2075_v3 = vpop.permute.xlu0 %2074  ;;  %v2266_v34 = vsel %vm2265_vm7, %v2264_v25, %v2071_v39  ;;  %vm2297_vm7 = vcmask 736256  }
 0x2c6   :  { %v2268_v57 = vsel %vm2267_vm8, %v2266_v34, %v2075_v3  ;;  %vm2299_vm8 = vcmask 752640  }
 0x2c8   :  { %v2079_v18 = vpop.permute.xlu1 %2078 }
 0x2c9   :  { %v2083_v24 = vpop.permute.xlu0 %2082  ;;  %v2270_v30 = vsel %vm2269_vm9, %v2268_v57, %v2079_v18  ;;  %vm2301_vm9 = vcmask 769024  }
 0x2ca   :  { %v2272_v41 = vsel %vm2271_vm10, %v2270_v30, %v2083_v24  ;;  %vm2303_vm10 = vcmask 785408  }
 0x2cc   :  { %v2087_v62 = vpop.permute.xlu1 %2086 }
 0x2cd   :  { %v2091_v38 = vpop.permute.xlu0 %2090  ;;  %v2274_v50 = vsel %vm2273_vm11, %v2272_v41, %v2087_v62  ;;  %vm2305_vm11 = vcmask 801792  }
 0x2ce   :  { %v2276_v48 = vsel %vm2275_vm12, %v2274_v50, %v2091_v38  ;;  %vm2307_vm12 = vcmask 818176  }
 0x2d0   :  { %v2095_v58 = vpop.permute.xlu1 %2094 }
 0x2d1   :  { %v2099_v1 = vpop.permute.xlu0 %2098  ;;  %v2278_v59 = vsel %vm2277_vm13, %v2276_v48, %v2095_v58  ;;  %vm2309_vm13 = vcmask 834560  }
 0x2d2   :  { %v2280_v8 = vsel %vm2279_vm14, %v2278_v59, %v2099_v1  ;;  %vm2311_vm14 = vcmask 850944  }
 0x2d4   :  { %v2103_v14 = vpop.permute.xlu1 %2102 }
 0x2d5   :  { %v2107_v43 = vpop.permute.xlu0 %2106  ;;  %v2282_v47 = vsel %vm2281_vm15, %v2280_v8, %v2103_v14  ;;  %vm2313_vm15 = vcmask 867328  }
 0x2d6   :  { %v2284_v29 = vsel %vm2283_vm0, %v2282_v47, %v2107_v43  ;;  %vm2315_vm0 = vcmask 883712  }
 0x2d8   :  { %v2111_v9 = vpop.permute.xlu1 %2110 }
 0x2d9   :  { %v2115_v37 = vpop.permute.xlu0 %2114  ;;  %v2286_v19 = vsel %vm2285_vm1, %v2284_v29, %v2111_v9  ;;  %vm2317_vm1 = vcmask 900096  }
 0x2da   :  { %v2288_v6 = vsel %vm2287_vm2, %v2286_v19, %v2115_v37  ;;  %vm2319_vm2 = vcmask 916480  }
 0x2dc   :  { %v2119_v63 = vpop.permute.xlu1 %2118 }
 0x2dd   :  { %v2123_v44 = vpop.permute.xlu0 %2122  ;;  %v2290_v22 = vsel %vm2289_vm3, %v2288_v6, %v2119_v63  ;;  %vm2321_vm3 = vcmask 932864  }
 0x2de   :  { %v2292_v23 = vsel %vm2291_vm4, %v2290_v22, %v2123_v44  ;;  %vm2323_vm4 = vcmask 949248  }
 0x2e0   :  { %v2127_v20 = vpop.permute.xlu1 %2126 }
 0x2e1   :  { %v2131_v21 = vpop.permute.xlu0 %2130  ;;  %v2294_v52 = vsel %vm2293_vm5, %v2292_v23, %v2127_v20  ;;  %vm2325_vm5 = vcmask 965632  }
 0x2e2   :  { %v2296_v11 = vsel %vm2295_vm6, %v2294_v52, %v2131_v21  ;;  %vm2327_vm6 = vcmask 982016  }
 0x2e4   :  { %v2135_v32 = vpop.permute.xlu1 %2134 }
 0x2e5   :  { %v2139_v40 = vpop.permute.xlu0 %2138  ;;  %v2298_v35 = vsel %vm2297_vm7, %v2296_v11, %v2135_v32  ;;  %vm2329_vm7 = vcmask 998400  }
 0x2e6   :  { %v2300_v10 = vsel %vm2299_vm8, %v2298_v35, %v2139_v40  ;;  %vm2331_vm8 = vcmask 1014784  }
 0x2e8   :  { %v2143_v7 = vpop.permute.xlu1 %2142 }
 0x2e9   :  { %v2147_v51 = vpop.permute.xlu0 %2146  ;;  %v2302_v31 = vsel %vm2301_vm9, %v2300_v10, %v2143_v7  ;;  %vm2333_vm9 = vcmask 1031168  }
 0x2ea   :  { %v2304_v55 = vsel %vm2303_vm10, %v2302_v31, %v2147_v51 }
 0x2ec   :  { %v2151_v15 = vpop.permute.xlu1 %2150 }
 0x2ed   :  { %v2155_v16 = vpop.permute.xlu0 %2154  ;;  %v2306_v12 = vsel %vm2305_vm11, %v2304_v55, %v2151_v15 }
 0x2ee   :  { %v2308_v17 = vsel %vm2307_vm12, %v2306_v12, %v2155_v16 }
 0x2f0   :  { %v2159_v45 = vpop.permute.xlu1 %2158 }
 0x2f1   :  { %v2163_v46 = vpop.permute.xlu0 %2162  ;;  %v2310_v5 = vsel %vm2309_vm13, %v2308_v17, %v2159_v45 }
 0x2f2   :  { %v2312_v42 = vsel %vm2311_vm14, %v2310_v5, %v2163_v46 }
 0x2f4   :  { %v2167_v56 = vpop.permute.xlu1 %2166 }
 0x2f5   :  { %v2171_v28 = vpop.permute.xlu0 %2170  ;;  %v2314_v2 = vsel %vm2313_vm15, %v2312_v42, %v2167_v56 }
 0x2f6   :  { %v2316_v36 = vsel %vm2315_vm0, %v2314_v2, %v2171_v28 }
 0x2f8   :  { %v2175_v0 = vpop.permute.xlu1 %2174 }
 0x2f9   :  { %v2179_v61 = vpop.permute.xlu0 %2178  ;;  %v2318_v27 = vsel %vm2317_vm1, %v2316_v36, %v2175_v0 }
 0x2fa   :  { %v2320_v13 = vsel %vm2319_vm2, %v2318_v27, %v2179_v61 }
 0x2fc   :  { %v2183_v60 = vpop.permute.xlu1 %2182 }
 0x2fd   :  { %v2187_v54 = vpop.permute.xlu0 %2186  ;;  %v2322_v33 = vsel %vm2321_vm3, %v2320_v13, %v2183_v60 }
 0x2fe   :  { %v2324_v53 = vsel %vm2323_vm4, %v2322_v33, %v2187_v54 }
 0x300   :  { %v2191_v49 = vpop.permute.xlu1 %2190 }
 0x301   :  { %v2195_v4 = vpop.permute.xlu0 %2194  ;;  %v2326_v26 = vsel %vm2325_vm5, %v2324_v53, %v2191_v49 }
 0x302   :  { %v2328_v25 = vsel %vm2327_vm6, %v2326_v26, %v2195_v4 }
 0x304   :  { %v2199_v39 = vpop.permute.xlu1 %2198 }
 0x305   :  { %v2330_v3 = vsel %vm2329_vm7, %v2328_v25, %v2199_v39  ;;  %v2203_v34 = vpop.permute.xlu0 %2202 }
 0x306   :  { %v2332_v57 = vsel %vm2331_vm8, %v2330_v3, %v2203_v34 }
 0x308   :  { %v2207_v18 = vpop.permute.xlu1 %2206 }
 0x309   :  { %v2334_v24 = vsel %vm2333_vm9, %v2332_v57, %v2207_v18 }
 0x30a   :  { %2335 = vst [vmem:[#allocation2] sm:$0xff] %v2334_v24 }
 0x30b   :  { %2461 = shalt.err (!%p2458_p4)
}
 0x30c   :  { %s2462_s23 = scalar_lea.hbm %s3350_s3, 128 }
 0x30d   :  { %p2463_p5 = scmp.ne.s32.totalorder %s3350_s3, %s2462_s23  ;;  %p2466_p6 = scmp.lt.u32.totalorder %s2462_s23, %s3350_s3 }
 0x30f   :  { %p2468_p7 = pnand %p2466_p6, %p2463_p5 }
 0x311   :  { %2471 = shalt.err (!%p2468_p7)
}
 0x312   :  { %2345 = dma.vmem_to_hbm [thread:$0]  %s2343_s19, 128, %s3350_s3, [#allocation3]  }
 0x313   :  { %2472 = dma.done.wait [#allocation3], 128  }
 0x314   :  { %2473 = vsyncadd [#allocation3], 4294967168 }
 0x315   :  { %2349 = vsyncpa [#allocation3], 1 }

// kernel: tpu_custom_call.1
= control target key start
LH: loop header
LB: loop body
LE: loop exit
PB: predicated region body
PF: predicated region fallthrough
CT: control target
= control target key end

     0   :  { %v310_v1 = vmov 0   ;;  %s383_s0 = inlined_call_operand.vmem [shape: f32[8,1], index: 0, kind: input, shape index: {}]   ;;  %s384_s1 = inlined_call_operand.vmem [shape: f32[1,128], index: 1, kind: input, shape index: {}]   ;;  %s385_s2 = inlined_call_operand.vmem [shape: f32[1,128], index: 2, kind: input, shape index: {}]   ;;  %s386_s3 = inlined_call_operand.hbm [shape: f32[8,128], index: 3, kind: output, shape index: {}]  }
   0x1   :  { %v15_v0 = vld [vmem:[%s383_s0] sm:$0xff]  ;;  %281 = vset.pattern.permute.xlu0 %v310_v1 }
   0x2   :  { %19 = vperm.xlu0 %281, %v15_v0  }
   0x3   :  { %8 = vsyncpa [#allocation3], 0  ;;  %v260_v2 = vld [vmem:[%s384_s1] ss:$0 sm:$0xff]  ;;  %v311_v15 = vmov 683565275  }
   0x4   :  { %v312_v17 = vmov 2475754826   ;;  %v313_v20 = vmov 2131351028   ;;  %v314_v23 = vmov 2102212464  }
   0x5   :  { %v315_v26 = vmov 920167782   ;;  %v316_v29 = vmov 1326507024  }
  0x81   :  { %v20_v3 = vpop.permute.xlu0 %19 }
  0x82   :  { %v345_v4 = vmul.f32 %v260_v2, %v20_v3 }
  0x84   :  { %v34_v5 = vand.u32 2139095040, %v345_v4  ;;  %v31_v9 = vand.u32 2147483647, %v345_v4  ;;  %vm33_vm7 = vcmp.lt.s32.totalorder %v345_v4, 0 }
  0x86   :  { %v35_v6 = vshrl.u32 %v34_v5, 23  ;;  %v38_v12 = vand.u32 8388607, %v31_v9  ;;  %vm32_vm8 = vcmp.le.f32.partialorder %v31_v9, 0.7853982 }
  0x88   :  { %v261_v7 = vadd.s32 4294967169, %v35_v6  ;;  %v39_v31 = vor.u32 8388608, %v38_v12 }
  0x8a   :  { %v41_v8 = vadd.s32 1, %v261_v7  ;;  %v79_v45 = vshll.u32 %v39_v31, 8 }
  0x8c   :  { %vm42_vm0 = vcmp.gt.s32.totalorder %v41_v8, 0 }
  0x8d   :  { %v43_v10 = vsel %vm42_vm0, %v41_v8, 0 }
  0x8e   :  { %v45_v11 = vand.u32 31, %v43_v10  ;;  %v44_v14 = vshrl.u32 %v43_v10, 5 }
  0x90   :  { %v46_v13 = vsub.s32 32, %v45_v11  ;;  %v48_v16 = vshll.u32 %v311_v15, %v45_v11  ;;  %v51_v18 = vshll.u32 %v312_v17, %v45_v11  ;;  %v54_v22 = vshll.u32 %v313_v20, %v45_v11 }
  0x91   :  { %v57_v25 = vshll.u32 %v314_v23, %v45_v11  ;;  %v60_v28 = vshll.u32 %v315_v26, %v45_v11  ;;  %vm63_vm1 = vcmp.lt.s32.totalorder %v44_v14, 1  ;;  %vm66_vm2 = vcmp.lt.s32.totalorder %v44_v14, 4 }
  0x92   :  { %v49_v19 = vshrl.u32 %v312_v17, %v46_v13  ;;  %v52_v21 = vshrl.u32 %v313_v20, %v46_v13  ;;  %v55_v24 = vshrl.u32 %v314_v23, %v46_v13  ;;  %v58_v27 = vshrl.u32 %v315_v26, %v46_v13 }
  0x93   :  { %v61_v30 = vshrl.u32 %v316_v29, %v46_v13  ;;  %v47_v40 = vshrl.u32 %v311_v15, %v46_v13  ;;  %vm65_vm3 = vcmp.lt.s32.totalorder %v44_v14, 3  ;;  %vm64_vm4 = vcmp.lt.s32.totalorder %v44_v14, 2 }
  0x94   :  { %v50_v32 = vor.u32 %v49_v19, %v48_v16  ;;  %v53_v33 = vor.u32 %v52_v21, %v51_v18  ;;  %v56_v34 = vor.u32 %v55_v24, %v54_v22  ;;  %v59_v35 = vor.u32 %v58_v27, %v57_v25  ;;  %v29_v24 = vld [vmem:[%s385_s2] sm:$0x1]  ;;  %s317_s2 = smov [#allocation2]  }
  0x95   :  { %v62_v36 = vor.u32 %v61_v30, %v60_v28  ;;  %v239_v20 = vlaneseq  ;;  %vm30_vm9 = vcmp.ne.f32.partialorder %v29_v24, 0.0  ;;  %s252_s16 = sshll.u32 %s317_s2, 4  ;;  %s253_s16 = int_to_ptr.vmem [resolvable:$true] %s252_s16 }
  0x96   :  { %v68_v37 = vsel %vm66_vm2, %v56_v34, 2102212464  ;;  %v71_v38 = vsel %vm63_vm1, %v50_v32, %v53_v33  ;;  %v75_v39 = vsel %vm63_vm1, %v53_v33, %v56_v34  ;;  %v72_v41 = vsel %vm66_vm2, %v59_v35, 920167782  ;;  %s286_s17 = scalar_lea.vmem %s253_s16, 128  ;;  %p291_p1 = scmp.lt.s32.totalorder %s253_s16, %s253_s16 }
  0x97   :  { %v76_v42 = vsel %vm66_vm2, %v62_v36, 1326507024  ;;  %v73_v43 = vsel %vm65_vm3, %v56_v34, %v72_v41  ;;  %v67_v46 = vsel %vm63_vm1, %v47_v40, %v50_v32  ;;  %v69_v47 = vsel %vm65_vm3, %v53_v33, %v68_v37  ;;  %p287_p0 = scmp.ne.s32.totalorder %s253_s16, %s286_s17  ;;  %p292_p2 = scmp.lt.s32.totalorder %s286_s17, %s286_s17 }
  0x98   :  { %v77_v44 = vsel %vm65_vm3, %v59_v35, %v76_v42  ;;  %v74_v48 = vsel %vm64_vm4, %v71_v38, %v73_v43  ;;  %v70_v54 = vsel %vm64_vm4, %v67_v46, %v69_v47  ;;  %v240_v26 = vshrl.u32 %v239_v20, 7 }
  0x99   :  { %v78_v49 = vsel %vm64_vm4, %v75_v39, %v77_v44  ;;  %v354_v52 = vmul.u32.u64.low %v79_v45, %v74_v48  ;;  %v355_v53 = vmul.u32.u64.high %v79_v45, %v74_v48, %v354_v52  ;;  %v86_v56 = vmul.u32 %v79_v45, %v70_v54  ;;  %p293_p3 = por %p292_p2, %p291_p1 }
  0x9a   :  { %v351_v50 = vmul.u32.u64.low %v79_v45, %v78_v49  ;;  %v352_v51 = vmul.u32.u64.high %v79_v45, %v78_v49, %v351_v50  ;;  %v241_v28 = vsub.s32 0, %v240_v26  ;;  %v238_v30 = vsel %vm30_vm9, 1, %v310_v1 }
  0x9b   :  { %v89_v55 = vadd.s32 1, %v355_v53  ;;  %vm123_vm1 = vweird.f32 %v345_v4  ;;  %p294_p4 = pnand %p293_p3, %p287_p0 }
  0x9c   :  { %vm88_vm5 = vc.u32 %v352_v51, %v354_v52  ;;  %v87_v6 = vadd.s32 %v354_v52, %v352_v51  ;;  %v242_v31 = vrot.slane %v238_v30, %v241_v28 }
  0x9d   :  { %v90_v57 = vsel %vm88_vm5, %v89_v55, %v355_v53 }
  0x9e   :  { %v91_v58 = vadd.s32 %v90_v57, %v86_v56  ;;  %vm243_vm10 = vcmp.eq.s32.totalorder %v242_v31, 1 }
  0xa0   :  { %v92_v59 = vadd.s32 536870912, %v91_v58 }
  0xa2   :  { %v93_v60 = vshrl.u32 %v92_v59, 30 }
  0xa4   :  { %v94_v61 = vshll.u32 %v93_v60, 30  ;;  %v117_v19 = vsub.s32 4, %v93_v60 }
  0xa6   :  { %v95_v62 = vsub.s32 %v91_v58, %v94_v61  ;;  %v118_v23 = vsel %vm33_vm7, %v117_v19, %v93_v60 }
  0xa7   :  { %v120_v27 = vsel %vm32_vm8, 0, %v118_v23 }
  0xa8   :  { %v97_v63 = vsub.s32 0, %v95_v62  ;;  %v227_v29 = vadd.s32 3, %v120_v27  ;;  %v124_v32 = vand.u32 3, %v120_v27 }
  0xaa   :  { %v262_v0 = vmin.u32 %v97_v63, %v95_v62  ;;  %v228_v9 = vand.u32 3, %v227_v29  ;;  %vm129_vm11 = vcmp.eq.s32.totalorder %v124_v32, 2  ;;  %vm126_vm13 = vcmp.eq.s32.totalorder %v124_v32, 0 }
  0xab   :  { %vm125_vm15 = vcmp.lt.s32.totalorder %v124_v32, 2 }
  0xac   :  { %v99_v2 = vclz %v262_v0  ;;  %vm233_vm12 = vcmp.eq.s32.totalorder %v228_v9, 2  ;;  %vm230_vm14 = vcmp.eq.s32.totalorder %v228_v9, 0  ;;  %vm229_vm0 = vcmp.lt.s32.totalorder %v228_v9, 2 }
  0xae   :  { %v263_v3 = vadd.s32 4294967294, %v99_v2 }
  0xb0   :  { %vm264_vm6 = vcmp.lt.s32.totalorder %v263_v3, 0 }
  0xb1   :  { %v102_v5 = vsel %vm264_vm6, 0, %v263_v3 }
  0xb2   :  { %v103_v7 = vsub.s32 32, %v102_v5  ;;  %v107_v8 = vsub.s32 4294967266, %v102_v5  ;;  %v104_v10 = vshll.u32 %v95_v62, %v102_v5 }
  0xb4   :  { %v105_v11 = vshrl.u32 %v87_v6, %v103_v7  ;;  %v108_v12 = vadd.s32 127, %v107_v8 }
  0xb6   :  { %v106_v13 = vor.u32 %v105_v11, %v104_v10  ;;  %v109_v14 = vshll.u32 %v108_v12, 23 }
  0xb8   :  { %v110_v15 = vor.u32 4788187, %v109_v14  ;;  %v113_v17 = vcvt.s32.f32 %v106_v13 }
  0xba   :  { %v111_v16 = vand.u32 2147483647, %v110_v15 }
  0xbc   :  { %v114_v18 = vmul.f32 %v113_v17, %v111_v16 }
  0xbe   :  { %v115_v21 = vxor.u32 2147483648, %v114_v18 }
  0xc0   :  { %v116_v22 = vsel %vm33_vm7, %v115_v21, %v114_v18 }
  0xc1   :  { %v119_v25 = vsel %vm32_vm8, %v345_v4, %v116_v22 }
  0xc2   :  { %282 = vcosq.f32 %v119_v25 }
  0xc3   :  { %284 = vsinq.f32 %v119_v25 }
  0xcc   :  { %v283_v33 = vpop.eup %282 }
  0xcd   :  { %v285_v34 = vpop.eup %284  ;;  %v130_v35 = vxor.u32 2147483648, %v283_v33 }
  0xce   :  { %v127_v36 = vxor.u32 2147483648, %v285_v34 }
  0xcf   :  { %v131_v37 = vsel %vm129_vm11, %v130_v35, %v285_v34  ;;  %v235_v38 = vsel %vm233_vm12, %v130_v35, %v285_v34 }
  0xd0   :  { %v128_v39 = vsel %vm126_vm13, %v283_v33, %v127_v36  ;;  %v232_v1 = vsel %vm230_vm14, %v283_v33, %v127_v36 }
  0xd1   :  { %v132_v40 = vsel %vm125_vm15, %v128_v39, %v131_v37  ;;  %v236_v41 = vsel %vm229_vm0, %v232_v1, %v235_v38 }
  0xd2   :  { %v133_v42 = vsel %vm123_vm1, nan, %v132_v40  ;;  %v237_v43 = vsel %vm123_vm1, nan, %v236_v41 }
  0xd3   :  { %v244_v44 = vsel %vm243_vm10, %v133_v42, %v237_v43 }
  0xd4   :  { %245 = vst [vmem:[#allocation2] sm:$0xff] %v244_v44 }
  0xd5   :  { %297 = shalt.err (!%p294_p4)
}
  0xd6   :  { %s298_s20 = scalar_lea.hbm %s386_s3, 128 }
  0xd7   :  { %p299_p5 = scmp.ne.s32.totalorder %s386_s3, %s298_s20  ;;  %p302_p6 = scmp.lt.u32.totalorder %s298_s20, %s386_s3 }
  0xd9   :  { %p304_p7 = pnand %p302_p6, %p299_p5 }
  0xdb   :  { %307 = shalt.err (!%p304_p7)
}
  0xdc   :  { %255 = dma.vmem_to_hbm [thread:$0]  %s253_s16, 128, %s386_s3, [#allocation3]  }
  0xdd   :  { %308 = dma.done.wait [#allocation3], 128  }
  0xde   :  { %309 = vsyncadd [#allocation3], 4294967168 }
  0xdf   :  { %259 = vsyncpa [#allocation3], 1 }

</bundles_post_ra>
